<compile_context>
chip_gen: v5e
topology: v5e:2x2
jax: 0.10.0
libtpu: 0.0.40
codegen_flags: <defaults>
</compile_context>

<pallas_src>
import math
import numpy as np
import jax
import jax.numpy as jnp
from jax.experimental import pallas as pl
from jax.experimental.pallas import tpu as pltpu


# ----------------------------------------------------------------------------
# Host-side (exact) build_targets, mirroring the PyTorch reference loops.
# ----------------------------------------------------------------------------
def build_targets_np(batch_size, B, C, grid_size, targets, anchors, masks,
                     strides, idx, anchor_t=4.0, append_g=0.5):
    t_obj = np.zeros((batch_size, B, grid_size, grid_size), np.float32)
    # multi-hot class targets packed as a per-cell bitmask (C <= 24 fits f32).
    t_cbits = np.zeros((batch_size, B, grid_size, grid_size), np.int64)
    t_box = np.zeros((batch_size, B, grid_size, grid_size, 4), np.float32)
    offsets = [(0, 0), (-1, 0), (0, -1), (1, 0), (0, 1)]
    for b in range(batch_size):
        tb = targets[targets[:, 0] == b][:, 1:]
        for t in tb:
            cls = int(t[0])
            assert cls < C, "oh shit"
            box = t[1:]
            shift = box[2:] * grid_size
            anc = anchors[masks[idx]] / strides[idx]
            ratio = shift / anc
            ratio_matches = np.max(np.maximum(ratio, 1.0 / ratio), axis=1) < anchor_t
            if ratio_matches.sum() == 0:
                continue
            gx = box[0] * grid_size
            gy = box[1] * grid_size
            i_base, j_base = int(gx), int(gy)
            off_i, off_j = gx % 1.0, gy % 1.0
            ij_pos = [
                True,
                bool(off_i < append_g and gx > 1.0),
                bool(off_j < append_g and gy > 1.0),
                bool(off_i > append_g and grid_size - gx > 1.0),
                bool(off_j > append_g and grid_size - gy > 1.0),
            ]
            for pos_idx, pos in enumerate(ij_pos):
                if not pos:
                    continue
                i = i_base + offsets[pos_idx][0]
                j = j_base + offsets[pos_idx][1]
                for m, rm in enumerate(ratio_matches):
                    if rm:
                        t_obj[b, m, j, i] = 1.0
                        t_cbits[b, m, j, i] |= (1 << cls)   # multi-hot (exact)
                        t_box[b, m, j, i] = box             # last writer wins
    return t_obj, t_cbits, t_box


def _pack_targets(t_obj, t_cbits, t_box, anc_sel, NR):
    """Pack targets into (G, 8, NR*128): [obj, cls_bits, x, y, w, h, aw, ah]."""
    batch, B, gsz, _ = t_obj.shape
    G, S = batch * B, gsz * gsz
    S_pad = NR * 128
    t = np.zeros((G, 8, S_pad), np.float32)
    t[:, 0, :S] = t_obj.reshape(G, S)
    t[:, 1, :S] = t_cbits.reshape(G, S).astype(np.float32)
    t[:, 2:6, :S] = t_box.reshape(G, S, 4).transpose(0, 2, 1)
    anc = np.broadcast_to(anc_sel[None, :, :], (batch, B, 2)).reshape(G, 2)
    t[:, 6, :] = anc[:, 0:1]
    t[:, 7, :] = anc[:, 1:2]
    return t


def _spatial_tiling(S):
    """Spatial cells -> (NR lane-rows of 128, TR rows per tile, NT tiles)."""
    NR = -(-S // 128)
    if NR <= 8:
        TR = NR                   # full-dim block (always legal)
    else:
        NR = -(-NR // 8) * 8      # pad rows to a multiple of 8
        TR = 8                    # <=1024 cells / tile: vreg-friendly
    return NR, TR, NR // TR


# ----------------------------------------------------------------------------
# In-kernel helpers (only ops with guaranteed Mosaic lowerings).
# ----------------------------------------------------------------------------
def _atan_pos(x):
    # atan(x) for x >= 0: range reduction + odd polynomial.
    # TODO(synk): replace with a native atan lowering if Mosaic exposes one.
    big = x > 1.0
    t = jnp.where(big, pl.reciprocal(x, approx=True), x)
    hi = t > 0.41421356
    u = jnp.where(hi, (t - 1.0) * pl.reciprocal(t + 1.0, approx=True), t)
    u2 = u * u
    r = u * (1.0 + u2 * (-1.0 / 3.0 + u2 * (1.0 / 5.0 + u2 * (-1.0 / 7.0
             + u2 * (1.0 / 9.0 + u2 * (-1.0 / 11.0))))))
    r = jnp.where(hi, (math.pi / 4.0) + r, r)
    return jnp.where(big, (math.pi / 2.0) - r, r)


def _bce_with_logits(x, z):
    return jnp.maximum(x, 0.0) - x * z + jnp.log(1.0 + jnp.exp(-jnp.abs(x)))


def _ciou(px, py, pw, ph, tx, ty, tw, th, eps=1e-7):
    b1_x1, b1_x2 = px - pw * 0.5, px + pw * 0.5
    b1_y1, b1_y2 = py - ph * 0.5, py + ph * 0.5
    b2_x1, b2_x2 = tx - tw * 0.5, tx + tw * 0.5
    b2_y1, b2_y2 = ty - th * 0.5, ty + th * 0.5
    inter = (jnp.maximum(jnp.minimum(b1_x2, b2_x2) - jnp.maximum(b1_x1, b2_x1), 0.0) *
             jnp.maximum(jnp.minimum(b1_y2, b2_y2) - jnp.maximum(b1_y1, b2_y1), 0.0))
    union = pw * ph + tw * th - inter + eps
    iou = inter * pl.reciprocal(union, approx=True)
    cw = jnp.maximum(b1_x2, b2_x2) - jnp.minimum(b1_x1, b2_x1)
    ch = jnp.maximum(b1_y2, b2_y2) - jnp.minimum(b1_y1, b2_y1)
    c2 = cw * cw + ch * ch + eps
    rho2 = ((b2_x1 + b2_x2 - b1_x1 - b1_x2) ** 2 +
            (b2_y1 + b2_y2 - b1_y1 - b1_y2) ** 2) * 0.25
    v = (4.0 / (math.pi ** 2)) * (
        _atan_pos(tw * pl.reciprocal(th + eps, approx=True)) -
        _atan_pos(pw * pl.reciprocal(ph + eps, approx=True))) ** 2
    alpha = v * pl.reciprocal(v - iou + (1.0 + eps), approx=True)
    return iou - (rho2 * pl.reciprocal(c2, approx=True) + v * alpha)


def _tsum(x):
    """(TR, 128) -> (1, 1) sum (lane reduce then sublane reduce)."""
    return jnp.sum(jnp.sum(x, axis=1, keepdims=True), axis=0, keepdims=True)


# ----------------------------------------------------------------------------
# Pallas kernel: obj BCE always; decode + CIoU + cls BCE only on positive tiles.
# ----------------------------------------------------------------------------
def _make_kernel(C, grid_size, net_size, scale_xy, TR, NT):
    gs_f = float(grid_size)
    pow2 = (grid_size & (grid_size - 1)) == 0
    inv_gs = 1.0 / gs_f
    inv_net = 1.0 / float(net_size)
    sxy = float(scale_xy)
    bias = 0.5 * (sxy - 1.0)

    def kernel(hp_ref, _bg_ref, _br_ref, pobj_ref, p_ref, t_ref, out_ref):
        g = pl.program_id(0)
        j = pl.program_id(1)
        flag = hp_ref[g * NT + j]

        lane = jax.lax.broadcasted_iota(jnp.int32, (1, 128), 1)
        pobj = pobj_ref[0, 0]                                # (TR, 128)

        # ------ negative tile: objectness BCE against all-zero target ------
        @pl.when(flag == 0)
        def _neg():
            obj_s = _tsum(_bce_with_logits(pobj, 0.0))
            out_ref[0] = jnp.where(lane == 2, obj_s, 0.0)

        # ------ tile containing at least one positive cell ------
        @pl.when(flag != 0)
        def _pos():
            lx = p_ref[0, 0]
            ly = p_ref[0, 1]
            lw = p_ref[0, 2]
            lh = p_ref[0, 3]

            tobj = t_ref[0, 0]
            tcb = t_ref[0, 1]
            tbx = t_ref[0, 2]
            tby = t_ref[0, 3]
            tbw = t_ref[0, 4]
            tbh = t_ref[0, 5]
            anw = t_ref[0, 6]
            anh = t_ref[0, 7]

            # grid offsets rebuilt in-register (no gxy DMA stream)
            r_iota = jax.lax.broadcasted_iota(jnp.int32, (TR, 128), 0)
            l_iota = jax.lax.broadcasted_iota(jnp.int32, (TR, 128), 1)
            sidx = ((j * TR + r_iota) * 128 + l_iota).astype(jnp.float32)
            q = sidx * inv_gs if pow2 else sidx / gs_f
            gy = jnp.floor(q)
            gx = sidx - gy * gs_f

            # box decode
            px = (jax.nn.sigmoid(lx) * sxy - bias + gx) * inv_gs
            py = (jax.nn.sigmoid(ly) * sxy - bias + gy) * inv_gs
            pw = jnp.exp(lw) * anw * inv_net
            ph = jnp.exp(lh) * anh * inv_net

            mask = tobj > 0.0
            maskf = mask.astype(jnp.float32)

            # negative lanes get a degenerate-but-finite self match so the
            # (discarded) CIoU stays free of NaN/inf even if exp() overflows.
            pw_s = jnp.where(mask, pw, 1.0)
            ph_s = jnp.where(mask, ph, 1.0)
            tx = jnp.where(mask, tbx, px)
            ty = jnp.where(mask, tby, py)
            tw = jnp.where(mask, tbw, 1.0)
            th = jnp.where(mask, tbh, 1.0)

            iou = _ciou(px, py, pw_s, ph_s, tx, ty, tw, th)   # (TR, 128)

            box_s = _tsum(maskf * (1.0 - iou))
            npos_s = _tsum(maskf)

            # targets_obj[obj_mask] = iou.detach().clamp(0)
            tobj_eff = jnp.where(mask, jnp.maximum(iou, 0.0), 0.0)
            obj_s = _tsum(_bce_with_logits(pobj, tobj_eff))

            # class BCE: per-class unrolled loop with in-register bit
            # extraction of the packed multi-hot bitmask (no (C,TS) temps).
            cls_cell = jnp.zeros((TR, 128), jnp.float32)
            rem = tcb
            for c in range(C):
                half = jnp.floor(rem * 0.5)
                bit = rem - 2.0 * half                        # exact 0/1
                cls_cell = cls_cell + _bce_with_logits(p_ref[0, 5 + c], bit)
                rem = half
            cls_s = _tsum(maskf * cls_cell)

            out_ref[0] = (jnp.where(lane == 0, box_s, 0.0)
                          + jnp.where(lane == 1, npos_s, 0.0)
                          + jnp.where(lane == 2, obj_s, 0.0)
                          + jnp.where(lane == 3, cls_s, 0.0))

    return kernel


# ----------------------------------------------------------------------------
# Wrapper reproducing YOLOV7Loss.forward
# ----------------------------------------------------------------------------
class YOLOV7LossPallas:
    def __init__(self, B=3, C=20, net_size=512, strides=None, anchors=None,
                 masks=None):
        assert C <= 24, "class bitmask packed in f32 requires C <= 24"  # TODO(synk): multi-channel bitmask for larger C
        self.B, self.C = B, C
        self.net_size = net_size
        self.strides = strides
        self.anchors = np.asarray(anchors, dtype=np.float32)
        self.masks = np.asarray(masks, dtype=np.int32)
        self.scale_x_y = [2.0, 2.0, 2.0]
        self.balance = [4.0, 1.0, 0.4]
        self.iou_normalizer = 0.05
        self.obj_normalizer = 0.7 * (self.net_size / 640) ** 2
        self.cls_normalizer = 0.3 * self.C / 80.0
        self.anchor_t = 4.0
        self.append_g = 0.5

    def __call__(self, preds, targets_np, idx):
        B, C = self.B, self.C
        batch_size, ch, gs, gs2 = preds.shape
        assert ch == B * (C + 5) and gs == gs2
        G = batch_size * B
        S = gs * gs
        N = float(G * S)

        NR, TR, NT = _spatial_tiling(S)
        S_pad = NR * 128

        # ---- predictions: f32 streamed straight from a (zero-copy) reshape ----
        p3 = jnp.reshape(preds, (G, C + 5, S))
        if S_pad != S:
            # pad logits with -100 so sigmoid()/softplus() of pad lanes ~ 0
            p3 = jnp.pad(p3, ((0, 0), (0, 0), (0, S_pad - S)),
                         constant_values=-100.0)
        p4 = jnp.reshape(p3, (G, C + 5, NR, 128))

        # ---- exact host build_targets + compact packing ----
        t_obj, t_cbits, t_box = build_targets_np(
            batch_size, B, C, gs, targets_np, self.anchors, self.masks,
            self.strides, idx, self.anchor_t, self.append_g)
        anc_sel = self.anchors[self.masks[idx]]
        t_flat = _pack_targets(t_obj, t_cbits, t_box, anc_sel, NR)  # (G,8,S_pad)
        t4 = t_flat.reshape(G, 8, NR, 128)

        # ---- scalar-prefetch: positivity flags + dedup'd DMA block map ----
        hp = (t4[:, 0].reshape(G, NT, TR, 128).max(axis=(2, 3)) > 0
              ).astype(np.int32).reshape(-1)                  # (G*NT,)
        bg = np.zeros(G * NT, np.int32)
        br = np.zeros(G * NT, np.int32)
        pos_f = np.nonzero(hp)[0]
        cg, cr = (divmod(int(pos_f[0]), NT) if pos_f.size else (0, 0))
        for f in range(G * NT):
            if hp[f]:
                cg, cr = divmod(f, NT)
            bg[f], br[f] = cg, cr

        kernel = _make_kernel(C, gs, self.net_size, self.scale_x_y[idx], TR, NT)

        grid_spec = pltpu.PrefetchScalarGridSpec(
            num_scalar_prefetch=3,
            grid=(G, NT),
            in_specs=[
                # obj logit row: second view of the SAME preds array, 1 channel
                pl.BlockSpec((1, 1, TR, 128),
                             lambda g, j, hp, bg, br: (g, 4, j, 0)),
                # full prediction rows: negative tiles point at the most
                # recently fetched positive block -> no wasted DMA
                pl.BlockSpec((1, C + 5, TR, 128),
                             lambda g, j, hp, bg, br:
                             (bg[g * NT + j], 0, br[g * NT + j], 0)),
                # packed targets: same dedup (only read on positive tiles)
                pl.BlockSpec((1, 8, TR, 128),
                             lambda g, j, hp, bg, br:
                             (bg[g * NT + j], 0, br[g * NT + j], 0)),
            ],
            out_specs=pl.BlockSpec((1, 1, 128),
                                   lambda g, j, hp, bg, br: (g * NT + j, 0, 0)),
        )

        sums = pl.pallas_call(
            kernel,
            grid_spec=grid_spec,
            out_shape=jax.ShapeDtypeStruct((G * NT, 1, 128), jnp.float32),
            compiler_params=pltpu.CompilerParams(
                dimension_semantics=("parallel", "parallel")),
        )(jnp.asarray(hp), jnp.asarray(bg), jnp.asarray(br), p4, p4,
          jnp.asarray(t4))

        tot = jnp.sum(sums[:, 0, :], axis=0)                  # (128,)
        box_sum, npos, obj_sum, cls_sum = tot[0], tot[1], tot[2], tot[3]

        pos = npos > 0.0
        loss_obj = obj_sum / N
        loss_cls = jnp.where(pos, cls_sum / jnp.maximum(npos * C, 1.0), 0.0)
        loss_box = jnp.where(pos, box_sum / jnp.maximum(npos, 1.0), 0.0)
        loss = (self.obj_normalizer * self.balance[idx] * loss_obj
                + self.cls_normalizer * loss_cls
                + self.iou_normalizer * loss_box)

        # aux (exact f32 preds + packed targets) for the numpy cross-check
        aux = (np.asarray(preds, dtype=np.float32).reshape(G, C + 5, S),
               t_flat[:, :, :S])
        return loss * batch_size, aux


# ----------------------------------------------------------------------------
# Pure-numpy reference (sanity check on the same transported inputs)
# ----------------------------------------------------------------------------
def reference_loss(p, t, C, gs, net_size, sxy, obj_norm, cls_norm, iou_norm,
                   balance, batch_size, eps=1e-7):
    p = np.asarray(p, np.float64)               # (G, C+5, S)
    t = np.asarray(t, np.float64)               # (G, 8,   S)
    G, _, S = p.shape
    s = np.arange(S, dtype=np.float64)
    gy = np.floor(s / gs)
    gx = s - gy * gs
    sig = 1.0 / (1.0 + np.exp(-p[:, 0:2]))
    px = (sig[:, 0] * sxy - 0.5 * (sxy - 1.0) + gx[None, :]) / gs
    py = (sig[:, 1] * sxy - 0.5 * (sxy - 1.0) + gy[None, :]) / gs
    pw = np.exp(p[:, 2]) * t[:, 6] / net_size
    ph = np.exp(p[:, 3]) * t[:, 7] / net_size
    pobj = p[:, 4]
    pcls = np.transpose(p[:, 5:5 + C], (0, 2, 1))      # (G, S, C)
    tobj = t[:, 0]
    tbits = np.round(t[:, 1]).astype(np.int64)
    tbx, tby, tbw, tbh = t[:, 2], t[:, 3], t[:, 4], t[:, 5]

    def bce(x, z):
        return np.maximum(x, 0) - x * z + np.log1p(np.exp(-np.abs(x)))

    mask = tobj > 0
    tobj_eff = np.zeros_like(tobj)
    if mask.sum() > 0:
        b1x, b1y, w1, h1 = px[mask], py[mask], pw[mask], ph[mask]
        b2x, b2y, w2, h2 = tbx[mask], tby[mask], tbw[mask], tbh[mask]
        b1x1, b1x2 = b1x - w1 / 2, b1x + w1 / 2
        b1y1, b1y2 = b1y - h1 / 2, b1y + h1 / 2
        b2x1, b2x2 = b2x - w2 / 2, b2x + w2 / 2
        b2y1, b2y2 = b2y - h2 / 2, b2y + h2 / 2
        inter = (np.clip(np.minimum(b1x2, b2x2) - np.maximum(b1x1, b2x1), 0, None) *
                 np.clip(np.minimum(b1y2, b2y2) - np.maximum(b1y1, b2y1), 0, None))
        union = w1 * h1 + w2 * h2 - inter + eps
        iou = inter / union
        cw = np.maximum(b1x2, b2x2) - np.minimum(b1x1, b2x1)
        ch = np.maximum(b1y2, b2y2) - np.minimum(b1y1, b2y1)
        c2 = cw ** 2 + ch ** 2 + eps
        rho2 = ((b2x1 + b2x2 - b1x1 - b1x2) ** 2 +
                (b2y1 + b2y2 - b1y1 - b1y2) ** 2) / 4.0
        v = (4.0 / math.pi ** 2) * (np.arctan(w2 / (h2 + eps)) -
                                    np.arctan(w1 / (h1 + eps))) ** 2
        alpha = v / (v - iou + 1.0 + eps)
        ciou = iou - (rho2 / c2 + v * alpha)
        loss_box = (1.0 - ciou).mean()
        bits = tbits[mask]
        onehot = ((bits[:, None] >> np.arange(C)[None, :]) & 1).astype(np.float64)
        loss_cls = bce(pcls[mask], onehot).mean()
        tobj_eff[mask] = np.clip(ciou, 0.0, None)
    else:
        loss_box, loss_cls = 0.0, 0.0
    loss_obj = bce(pobj, tobj_eff).mean()
    loss = obj_norm * balance * loss_obj + cls_norm * loss_cls + iou_norm * loss_box
    return loss * batch_size


if __name__ == "__main__":
    # Deterministic synthetic setup (B=3 anchors, C=20 classes).
    B, C = 3, 20
    net_size = 512
    strides = [8, 16, 32]
    anchors = [[12, 16], [19, 36], [40, 28], [36, 75], [76, 55],
               [72, 146], [142, 110], [192, 243], [459, 401]]
    masks = [[0, 1, 2], [3, 4, 5], [6, 7, 8]]
    batch_size = 2

    targets = np.array([
        [0, 3, 0.52, 0.48, 0.30, 0.25],
        [0, 7, 0.25, 0.70, 0.40, 0.35],
        [1, 1, 0.60, 0.30, 0.20, 0.45],
        [1, 5, 0.30, 0.62, 0.0234375, 0.03125],   # tiny box -> positives on the stride-8 head
    ], dtype=np.float32)

    loss_mod = YOLOV7LossPallas(B=B, C=C, net_size=net_size, strides=strides,
                                anchors=anchors, masks=masks)

    key = jax.random.PRNGKey(0)
    # idx=2: gs=16 (full-dim tile, NT=1, dense positives)
    # idx=0: gs=64 (TR=8 sublane-dense tiles, NT=4, sparse positives + dedup)
    for idx in (2, 0):
        gs = net_size // strides[idx]
        key, sub = jax.random.split(key)
        preds = jax.random.normal(sub, (batch_size, B * (C + 5), gs, gs),
                                  dtype=jnp.float32) * 0.5
        loss, (p_used, t_used) = loss_mod(preds, targets, idx)
        loss = jax.block_until_ready(loss)

        ref = reference_loss(p_used, t_used, C=C, gs=gs, net_size=net_size,
                             sxy=loss_mod.scale_x_y[idx],
                             obj_norm=loss_mod.obj_normalizer,
                             cls_norm=loss_mod.cls_normalizer,
                             iou_norm=loss_mod.iou_normalizer,
                             balance=loss_mod.balance[idx],
                             batch_size=batch_size)
        np.testing.assert_allclose(float(loss), float(ref), rtol=5e-3, atol=1e-3)
        assert np.isfinite(float(loss))
    print("KERNEL_OK")
</pallas_src>

<mosaic_0001>
module attributes {stable_mosaic.version = 11 : i64} {
  func.func @kernel(%arg0: i32, %arg1: i32, %arg2: memref<6xi32, #tpu.memory_space<smem>>, %arg3: memref<6xi32, #tpu.memory_space<smem>>, %arg4: memref<6xi32, #tpu.memory_space<smem>>, %arg5: memref<1x1x2x128xf32, #tpu.memory_space<vmem>>, %arg6: memref<1x25x2x128xf32, #tpu.memory_space<vmem>>, %arg7: memref<1x8x2x128xf32, #tpu.memory_space<vmem>>, %arg8: memref<1x1x128xf32, #tpu.memory_space<vmem>>) attributes {dimension_semantics = [#tpu.dimension_semantics<parallel>, #tpu.dimension_semantics<parallel>], iteration_bounds = array<i64: 6, 1>, scalar_prefetch = 3 : i64, scratch_operands = 0 : i64, tpu.core_type = #tpu.core_type<tc>, window_params = [{transform_indices = @transform_0, window_bounds = array<i64: 1, 1, 2, 128>}, {transform_indices = @transform_1, window_bounds = array<i64: 1, 25, 2, 128>}, {transform_indices = @transform_2, window_bounds = array<i64: 1, 8, 2, 128>}, {transform_indices = @transform_3, window_bounds = array<i64: 1, 1, 128>}]} {
    %c1_i32 = arith.constant 1 : i32
    %0 = arith.muli %arg0, %c1_i32 : i32
    %1 = arith.addi %0, %arg1 : i32
    %2 = arith.index_cast %1 : i32 to index
    %3 = memref.load %arg2[%2] : memref<6xi32, #tpu.memory_space<smem>>
    %4 = tpu.iota {dimensions = array<i32: 1>} : vector<1x128xi32>
    %c0 = arith.constant 0 : index
    %c0_0 = arith.constant 0 : index
    %c0_1 = arith.constant 0 : index
    %c0_2 = arith.constant 0 : index
    %5 = vector.load %arg5[%c0, %c0_0, %c0_1, %c0_2] : memref<1x1x2x128xf32, #tpu.memory_space<vmem>>, vector<1x1x2x128xf32>
    %6 = vector.shape_cast %5 : vector<1x1x2x128xf32> to vector<2x128xf32>
    %c0_i32 = arith.constant 0 : i32
    %7 = arith.cmpi eq, %3, %c0_i32 : i32
    %8 = arith.extui %7 : i1 to i32
    %c0_i32_3 = arith.constant 0 : i32
    %9 = arith.cmpi ne, %8, %c0_i32_3 : i32
    scf.if %9 {
      %cst = arith.constant 0.000000e+00 : f32
      %13 = vector.broadcast %cst : f32 to vector<2x128xf32>
      %14 = arith.maximumf %6, %13 : vector<2x128xf32>
      %cst_6 = arith.constant 0.000000e+00 : f32
      %15 = vector.broadcast %cst_6 : f32 to vector<2x128xf32>
      %16 = arith.mulf %6, %15 : vector<2x128xf32>
      %17 = arith.subf %14, %16 : vector<2x128xf32>
      %18 = math.absf %6 : vector<2x128xf32>
      %cst_7 = arith.constant 0.000000e+00 : f32
      %19 = vector.broadcast %cst_7 : f32 to vector<2x128xf32>
      %20 = arith.subf %19, %18 : vector<2x128xf32>
      %21 = math.exp %20 : vector<2x128xf32>
      %cst_8 = arith.constant 1.000000e+00 : f32
      %22 = vector.broadcast %cst_8 : f32 to vector<2x128xf32>
      %23 = arith.addf %22, %21 : vector<2x128xf32>
      %24 = math.log %23 : vector<2x128xf32>
      %25 = arith.addf %17, %24 : vector<2x128xf32>
      %cst_9 = arith.constant dense<0.000000e+00> : vector<2xf32>
      %26 = vector.multi_reduction <add>, %25, %cst_9 [1] : vector<2x128xf32> to vector<2xf32>
      %27 = vector.shape_cast %26 : vector<2xf32> to vector<2x1xf32>
      %cst_10 = arith.constant dense<0.000000e+00> : vector<1xf32>
      %28 = vector.multi_reduction <add>, %27, %cst_10 [0] : vector<2x1xf32> to vector<1xf32>
      %29 = vector.shape_cast %28 : vector<1xf32> to vector<1x1xf32>
      %c2_i32 = arith.constant 2 : i32
      %30 = vector.broadcast %c2_i32 : i32 to vector<1x128xi32>
      %31 = arith.cmpi eq, %4, %30 : vector<1x128xi32>
      %cst_11 = arith.constant 0.000000e+00 : f32
      %32 = vector.shape_cast %29 : vector<1x1xf32> to vector<1x1xf32>
      %33 = vector.broadcast %32 : vector<1x1xf32> to vector<1x128xf32>
      %34 = vector.broadcast %cst_11 : f32 to vector<1x128xf32>
      %35 = arith.select %31, %33, %34 : vector<1x128xi1>, vector<1x128xf32>
      %c0_12 = arith.constant 0 : index
      %c0_13 = arith.constant 0 : index
      %c0_14 = arith.constant 0 : index
      %36 = vector.load %arg8[%c0_12, %c0_13, %c0_14] : memref<1x1x128xf32, #tpu.memory_space<vmem>>, vector<1x1x128xf32>
      %37 = vector.shape_cast %36 : vector<1x1x128xf32> to vector<1x128xf32>
      %38 = vector.shape_cast %35 : vector<1x128xf32> to vector<1x1x128xf32>
      tpu.vector_store %arg8[%c0_12, %c0_13, %c0_14], %38 {strides = array<i32>} : memref<1x1x128xf32, #tpu.memory_space<vmem>>, vector<1x1x128xf32>,
    } else {
    }
    %c0_i32_4 = arith.constant 0 : i32
    %10 = arith.cmpi ne, %3, %c0_i32_4 : i32
    %11 = arith.extui %10 : i1 to i32
    %c0_i32_5 = arith.constant 0 : i32
    %12 = arith.cmpi ne, %11, %c0_i32_5 : i32
    scf.if %12 {
      %c0_6 = arith.constant 0 : index
      %c0_7 = arith.constant 0 : index
      %c0_8 = arith.constant 0 : index
      %c0_9 = arith.constant 0 : index
      %13 = vector.load %arg6[%c0_6, %c0_7, %c0_8, %c0_9] : memref<1x25x2x128xf32, #tpu.memory_space<vmem>>, vector<1x1x2x128xf32>
      %14 = vector.shape_cast %13 : vector<1x1x2x128xf32> to vector<2x128xf32>
      %c0_10 = arith.constant 0 : index
      %c1 = arith.constant 1 : index
      %c0_11 = arith.constant 0 : index
      %c0_12 = arith.constant 0 : index
      %15 = vector.load %arg6[%c0_10, %c1, %c0_11, %c0_12] : memref<1x25x2x128xf32, #tpu.memory_space<vmem>>, vector<1x1x2x128xf32>
      %16 = vector.shape_cast %15 : vector<1x1x2x128xf32> to vector<2x128xf32>
      %c0_13 = arith.constant 0 : index
      %c2 = arith.constant 2 : index
      %c0_14 = arith.constant 0 : index
      %c0_15 = arith.constant 0 : index
      %17 = vector.load %arg6[%c0_13, %c2, %c0_14, %c0_15] : memref<1x25x2x128xf32, #tpu.memory_space<vmem>>, vector<1x1x2x128xf32>
      %18 = vector.shape_cast %17 : vector<1x1x2x128xf32> to vector<2x128xf32>
      %c0_16 = arith.constant 0 : index
      %c3 = arith.constant 3 : index
      %c0_17 = arith.constant 0 : index
      %c0_18 = arith.constant 0 : index
      %19 = vector.load %arg6[%c0_16, %c3, %c0_17, %c0_18] : memref<1x25x2x128xf32, #tpu.memory_space<vmem>>, vector<1x1x2x128xf32>
      %20 = vector.shape_cast %19 : vector<1x1x2x128xf32> to vector<2x128xf32>
      %c0_19 = arith.constant 0 : index
      %c0_20 = arith.constant 0 : index
      %c0_21 = arith.constant 0 : index
      %c0_22 = arith.constant 0 : index
      %21 = vector.load %arg7[%c0_19, %c0_20, %c0_21, %c0_22] : memref<1x8x2x128xf32, #tpu.memory_space<vmem>>, vector<1x1x2x128xf32>
      %22 = vector.shape_cast %21 : vector<1x1x2x128xf32> to vector<2x128xf32>
      %c0_23 = arith.constant 0 : index
      %c1_24 = arith.constant 1 : index
      %c0_25 = arith.constant 0 : index
      %c0_26 = arith.constant 0 : index
      %23 = vector.load %arg7[%c0_23, %c1_24, %c0_25, %c0_26] : memref<1x8x2x128xf32, #tpu.memory_space<vmem>>, vector<1x1x2x128xf32>
      %24 = vector.shape_cast %23 : vector<1x1x2x128xf32> to vector<2x128xf32>
      %c0_27 = arith.constant 0 : index
      %c2_28 = arith.constant 2 : index
      %c0_29 = arith.constant 0 : index
      %c0_30 = arith.constant 0 : index
      %25 = vector.load %arg7[%c0_27, %c2_28, %c0_29, %c0_30] : memref<1x8x2x128xf32, #tpu.memory_space<vmem>>, vector<1x1x2x128xf32>
      %26 = vector.shape_cast %25 : vector<1x1x2x128xf32> to vector<2x128xf32>
      %c0_31 = arith.constant 0 : index
      %c3_32 = arith.constant 3 : index
      %c0_33 = arith.constant 0 : index
      %c0_34 = arith.constant 0 : index
      %27 = vector.load %arg7[%c0_31, %c3_32, %c0_33, %c0_34] : memref<1x8x2x128xf32, #tpu.memory_space<vmem>>, vector<1x1x2x128xf32>
      %28 = vector.shape_cast %27 : vector<1x1x2x128xf32> to vector<2x128xf32>
      %c0_35 = arith.constant 0 : index
      %c4 = arith.constant 4 : index
      %c0_36 = arith.constant 0 : index
      %c0_37 = arith.constant 0 : index
      %29 = vector.load %arg7[%c0_35, %c4, %c0_36, %c0_37] : memref<1x8x2x128xf32, #tpu.memory_space<vmem>>, vector<1x1x2x128xf32>
      %30 = vector.shape_cast %29 : vector<1x1x2x128xf32> to vector<2x128xf32>
      %c0_38 = arith.constant 0 : index
      %c5 = arith.constant 5 : index
      %c0_39 = arith.constant 0 : index
      %c0_40 = arith.constant 0 : index
      %31 = vector.load %arg7[%c0_38, %c5, %c0_39, %c0_40] : memref<1x8x2x128xf32, #tpu.memory_space<vmem>>, vector<1x1x2x128xf32>
      %32 = vector.shape_cast %31 : vector<1x1x2x128xf32> to vector<2x128xf32>
      %c0_41 = arith.constant 0 : index
      %c6 = arith.constant 6 : index
      %c0_42 = arith.constant 0 : index
      %c0_43 = arith.constant 0 : index
      %33 = vector.load %arg7[%c0_41, %c6, %c0_42, %c0_43] : memref<1x8x2x128xf32, #tpu.memory_space<vmem>>, vector<1x1x2x128xf32>
      %34 = vector.shape_cast %33 : vector<1x1x2x128xf32> to vector<2x128xf32>
      %c0_44 = arith.constant 0 : index
      %c7 = arith.constant 7 : index
      %c0_45 = arith.constant 0 : index
      %c0_46 = arith.constant 0 : index
      %35 = vector.load %arg7[%c0_44, %c7, %c0_45, %c0_46] : memref<1x8x2x128xf32, #tpu.memory_space<vmem>>, vector<1x1x2x128xf32>
      %36 = vector.shape_cast %35 : vector<1x1x2x128xf32> to vector<2x128xf32>
      %37 = tpu.iota {dimensions = array<i32: 0>} : vector<2x128xi32>
      %38 = tpu.iota {dimensions = array<i32: 1>} : vector<2x128xi32>
      %c2_i32 = arith.constant 2 : i32
      %39 = arith.muli %arg1, %c2_i32 : i32
      %40 = vector.broadcast %39 : i32 to vector<2x128xi32>
      %41 = arith.addi %40, %37 : vector<2x128xi32>
      %c128_i32 = arith.constant 128 : i32
      %42 = vector.broadcast %c128_i32 : i32 to vector<2x128xi32>
      %43 = arith.muli %41, %42 : vector<2x128xi32>
      %44 = arith.addi %43, %38 : vector<2x128xi32>
      %45 = arith.sitofp %44 : vector<2x128xi32> to vector<2x128xf32>
      %cst = arith.constant 6.250000e-02 : f32
      %46 = vector.broadcast %cst : f32 to vector<2x128xf32>
      %47 = arith.mulf %45, %46 : vector<2x128xf32>
      %48 = math.floor %47 : vector<2x128xf32>
      %cst_47 = arith.constant 1.600000e+01 : f32
      %49 = vector.broadcast %cst_47 : f32 to vector<2x128xf32>
      %50 = arith.mulf %48, %49 : vector<2x128xf32>
      %51 = arith.subf %45, %50 : vector<2x128xf32>
      %52 = arith.negf %14 : vector<2x128xf32>
      %53 = math.exp %52 : vector<2x128xf32>
      %cst_48 = arith.constant 1.000000e+00 : f32
      %54 = vector.broadcast %cst_48 : f32 to vector<2x128xf32>
      %55 = arith.addf %54, %53 : vector<2x128xf32>
      %56 = arith.divf %54, %55 : vector<2x128xf32>
      %cst_49 = arith.constant 2.000000e+00 : f32
      %57 = vector.broadcast %cst_49 : f32 to vector<2x128xf32>
      %58 = arith.mulf %56, %57 : vector<2x128xf32>
      %cst_50 = arith.constant 5.000000e-01 : f32
      %59 = vector.broadcast %cst_50 : f32 to vector<2x128xf32>
      %60 = arith.subf %58, %59 : vector<2x128xf32>
      %61 = arith.addf %60, %51 : vector<2x128xf32>
      %cst_51 = arith.constant 6.250000e-02 : f32
      %62 = vector.broadcast %cst_51 : f32 to vector<2x128xf32>
      %63 = arith.mulf %61, %62 : vector<2x128xf32>
      %64 = arith.negf %16 : vector<2x128xf32>
      %65 = math.exp %64 : vector<2x128xf32>
      %cst_52 = arith.constant 1.000000e+00 : f32
      %66 = vector.broadcast %cst_52 : f32 to vector<2x128xf32>
      %67 = arith.addf %66, %65 : vector<2x128xf32>
      %68 = arith.divf %66, %67 : vector<2x128xf32>
      %cst_53 = arith.constant 2.000000e+00 : f32
      %69 = vector.broadcast %cst_53 : f32 to vector<2x128xf32>
      %70 = arith.mulf %68, %69 : vector<2x128xf32>
      %cst_54 = arith.constant 5.000000e-01 : f32
      %71 = vector.broadcast %cst_54 : f32 to vector<2x128xf32>
      %72 = arith.subf %70, %71 : vector<2x128xf32>
      %73 = arith.addf %72, %48 : vector<2x128xf32>
      %cst_55 = arith.constant 6.250000e-02 : f32
      %74 = vector.broadcast %cst_55 : f32 to vector<2x128xf32>
      %75 = arith.mulf %73, %74 : vector<2x128xf32>
      %76 = math.exp %18 : vector<2x128xf32>
      %77 = arith.mulf %76, %34 : vector<2x128xf32>
      %cst_56 = arith.constant 0.001953125 : f32
      %78 = vector.broadcast %cst_56 : f32 to vector<2x128xf32>
      %79 = arith.mulf %77, %78 : vector<2x128xf32>
      %80 = math.exp %20 : vector<2x128xf32>
      %81 = arith.mulf %80, %36 : vector<2x128xf32>
      %cst_57 = arith.constant 0.001953125 : f32
      %82 = vector.broadcast %cst_57 : f32 to vector<2x128xf32>
      %83 = arith.mulf %81, %82 : vector<2x128xf32>
      %cst_58 = arith.constant 0.000000e+00 : f32
      %84 = vector.broadcast %cst_58 : f32 to vector<2x128xf32>
      %85 = arith.cmpf ogt, %22, %84 : vector<2x128xf32>
      %86 = arith.extui %85 : vector<2x128xi1> to vector<2x128xi32>
      %87 = arith.sitofp %86 : vector<2x128xi32> to vector<2x128xf32>
      %cst_59 = arith.constant 1.000000e+00 : f32
      %88 = vector.broadcast %cst_59 : f32 to vector<2x128xf32>
      %89 = arith.select %85, %79, %88 : vector<2x128xi1>, vector<2x128xf32>
      %cst_60 = arith.constant 1.000000e+00 : f32
      %90 = vector.broadcast %cst_60 : f32 to vector<2x128xf32>
      %91 = arith.select %85, %83, %90 : vector<2x128xi1>, vector<2x128xf32>
      %92 = arith.select %85, %26, %63 : vector<2x128xi1>, vector<2x128xf32>
      %93 = arith.select %85, %28, %75 : vector<2x128xi1>, vector<2x128xf32>
      %cst_61 = arith.constant 1.000000e+00 : f32
      %94 = vector.broadcast %cst_61 : f32 to vector<2x128xf32>
      %95 = arith.select %85, %30, %94 : vector<2x128xi1>, vector<2x128xf32>
      %cst_62 = arith.constant 1.000000e+00 : f32
      %96 = vector.broadcast %cst_62 : f32 to vector<2x128xf32>
      %97 = arith.select %85, %32, %96 : vector<2x128xi1>, vector<2x128xf32>
      %cst_63 = arith.constant 5.000000e-01 : f32
      %98 = vector.broadcast %cst_63 : f32 to vector<2x128xf32>
      %99 = arith.mulf %89, %98 : vector<2x128xf32>
      %100 = arith.subf %63, %99 : vector<2x128xf32>
      %cst_64 = arith.constant 5.000000e-01 : f32
      %101 = vector.broadcast %cst_64 : f32 to vector<2x128xf32>
      %102 = arith.mulf %89, %101 : vector<2x128xf32>
      %103 = arith.addf %63, %102 : vector<2x128xf32>
      %cst_65 = arith.constant 5.000000e-01 : f32
      %104 = vector.broadcast %cst_65 : f32 to vector<2x128xf32>
      %105 = arith.mulf %91, %104 : vector<2x128xf32>
      %106 = arith.subf %75, %105 : vector<2x128xf32>
      %cst_66 = arith.constant 5.000000e-01 : f32
      %107 = vector.broadcast %cst_66 : f32 to vector<2x128xf32>
      %108 = arith.mulf %91, %107 : vector<2x128xf32>
      %109 = arith.addf %75, %108 : vector<2x128xf32>
      %cst_67 = arith.constant 5.000000e-01 : f32
      %110 = vector.broadcast %cst_67 : f32 to vector<2x128xf32>
      %111 = arith.mulf %95, %110 : vector<2x128xf32>
      %112 = arith.subf %92, %111 : vector<2x128xf32>
      %cst_68 = arith.constant 5.000000e-01 : f32
      %113 = vector.broadcast %cst_68 : f32 to vector<2x128xf32>
      %114 = arith.mulf %95, %113 : vector<2x128xf32>
      %115 = arith.addf %92, %114 : vector<2x128xf32>
      %cst_69 = arith.constant 5.000000e-01 : f32
      %116 = vector.broadcast %cst_69 : f32 to vector<2x128xf32>
      %117 = arith.mulf %97, %116 : vector<2x128xf32>
      %118 = arith.subf %93, %117 : vector<2x128xf32>
      %cst_70 = arith.constant 5.000000e-01 : f32
      %119 = vector.broadcast %cst_70 : f32 to vector<2x128xf32>
      %120 = arith.mulf %97, %119 : vector<2x128xf32>
      %121 = arith.addf %93, %120 : vector<2x128xf32>
      %122 = arith.minimumf %103, %115 : vector<2x128xf32>
      %123 = arith.maximumf %100, %112 : vector<2x128xf32>
      %124 = arith.subf %122, %123 : vector<2x128xf32>
      %cst_71 = arith.constant 0.000000e+00 : f32
      %125 = vector.broadcast %cst_71 : f32 to vector<2x128xf32>
      %126 = arith.maximumf %124, %125 : vector<2x128xf32>
      %127 = arith.minimumf %109, %121 : vector<2x128xf32>
      %128 = arith.maximumf %106, %118 : vector<2x128xf32>
      %129 = arith.subf %127, %128 : vector<2x128xf32>
      %cst_72 = arith.constant 0.000000e+00 : f32
      %130 = vector.broadcast %cst_72 : f32 to vector<2x128xf32>
      %131 = arith.maximumf %129, %130 : vector<2x128xf32>
      %132 = arith.mulf %126, %131 : vector<2x128xf32>
      %133 = arith.mulf %89, %91 : vector<2x128xf32>
      %134 = arith.mulf %95, %97 : vector<2x128xf32>
      %135 = arith.addf %133, %134 : vector<2x128xf32>
      %136 = arith.subf %135, %132 : vector<2x128xf32>
      %cst_73 = arith.constant 1.000000e-07 : f32
      %137 = vector.broadcast %cst_73 : f32 to vector<2x128xf32>
      %138 = arith.addf %136, %137 : vector<2x128xf32>
      %139 = tpu.reciprocal %138 {approx = true} : vector<2x128xf32> -> vector<2x128xf32>
      %140 = arith.mulf %132, %139 : vector<2x128xf32>
      %141 = arith.maximumf %103, %115 : vector<2x128xf32>
      %142 = arith.minimumf %100, %112 : vector<2x128xf32>
      %143 = arith.subf %141, %142 : vector<2x128xf32>
      %144 = arith.maximumf %109, %121 : vector<2x128xf32>
      %145 = arith.minimumf %106, %118 : vector<2x128xf32>
      %146 = arith.subf %144, %145 : vector<2x128xf32>
      %147 = arith.mulf %143, %143 : vector<2x128xf32>
      %148 = arith.mulf %146, %146 : vector<2x128xf32>
      %149 = arith.addf %147, %148 : vector<2x128xf32>
      %cst_74 = arith.constant 1.000000e-07 : f32
      %150 = vector.broadcast %cst_74 : f32 to vector<2x128xf32>
      %151 = arith.addf %149, %150 : vector<2x128xf32>
      %152 = arith.addf %112, %115 : vector<2x128xf32>
      %153 = arith.subf %152, %100 : vector<2x128xf32>
      %154 = arith.subf %153, %103 : vector<2x128xf32>
      %155 = arith.mulf %154, %154 : vector<2x128xf32>
      %156 = arith.addf %118, %121 : vector<2x128xf32>
      %157 = arith.subf %156, %106 : vector<2x128xf32>
      %158 = arith.subf %157, %109 : vector<2x128xf32>
      %159 = arith.mulf %158, %158 : vector<2x128xf32>
      %160 = arith.addf %155, %159 : vector<2x128xf32>
      %cst_75 = arith.constant 2.500000e-01 : f32
      %161 = vector.broadcast %cst_75 : f32 to vector<2x128xf32>
      %162 = arith.mulf %160, %161 : vector<2x128xf32>
      %cst_76 = arith.constant 1.000000e-07 : f32
      %163 = vector.broadcast %cst_76 : f32 to vector<2x128xf32>
      %164 = arith.addf %97, %163 : vector<2x128xf32>
      %165 = tpu.reciprocal %164 {approx = true} : vector<2x128xf32> -> vector<2x128xf32>
      %166 = arith.mulf %95, %165 : vector<2x128xf32>
      %cst_77 = arith.constant 1.000000e+00 : f32
      %167 = vector.broadcast %cst_77 : f32 to vector<2x128xf32>
      %168 = arith.cmpf ogt, %166, %167 : vector<2x128xf32>
      %169 = tpu.reciprocal %166 {approx = true} : vector<2x128xf32> -> vector<2x128xf32>
      %170 = arith.select %168, %169, %166 : vector<2x128xi1>, vector<2x128xf32>
      %cst_78 = arith.constant 0.414213568 : f32
      %171 = vector.broadcast %cst_78 : f32 to vector<2x128xf32>
      %172 = arith.cmpf ogt, %170, %171 : vector<2x128xf32>
      %cst_79 = arith.constant 1.000000e+00 : f32
      %173 = vector.broadcast %cst_79 : f32 to vector<2x128xf32>
      %174 = arith.subf %170, %173 : vector<2x128xf32>
      %cst_80 = arith.constant 1.000000e+00 : f32
      %175 = vector.broadcast %cst_80 : f32 to vector<2x128xf32>
      %176 = arith.addf %170, %175 : vector<2x128xf32>
      %177 = tpu.reciprocal %176 {approx = true} : vector<2x128xf32> -> vector<2x128xf32>
      %178 = arith.mulf %174, %177 : vector<2x128xf32>
      %179 = arith.select %172, %178, %170 : vector<2x128xi1>, vector<2x128xf32>
      %180 = arith.mulf %179, %179 : vector<2x128xf32>
      %cst_81 = arith.constant -0.0909090936 : f32
      %181 = vector.broadcast %cst_81 : f32 to vector<2x128xf32>
      %182 = arith.mulf %180, %181 : vector<2x128xf32>
      %cst_82 = arith.constant 0.111111112 : f32
      %183 = vector.broadcast %cst_82 : f32 to vector<2x128xf32>
      %184 = arith.addf %183, %182 : vector<2x128xf32>
      %185 = arith.mulf %180, %184 : vector<2x128xf32>
      %cst_83 = arith.constant -0.142857149 : f32
      %186 = vector.broadcast %cst_83 : f32 to vector<2x128xf32>
      %187 = arith.addf %186, %185 : vector<2x128xf32>
      %188 = arith.mulf %180, %187 : vector<2x128xf32>
      %cst_84 = arith.constant 2.000000e-01 : f32
      %189 = vector.broadcast %cst_84 : f32 to vector<2x128xf32>
      %190 = arith.addf %189, %188 : vector<2x128xf32>
      %191 = arith.mulf %180, %190 : vector<2x128xf32>
      %cst_85 = arith.constant -0.333333343 : f32
      %192 = vector.broadcast %cst_85 : f32 to vector<2x128xf32>
      %193 = arith.addf %192, %191 : vector<2x128xf32>
      %194 = arith.mulf %180, %193 : vector<2x128xf32>
      %cst_86 = arith.constant 1.000000e+00 : f32
      %195 = vector.broadcast %cst_86 : f32 to vector<2x128xf32>
      %196 = arith.addf %195, %194 : vector<2x128xf32>
      %197 = arith.mulf %179, %196 : vector<2x128xf32>
      %cst_87 = arith.constant 0.785398185 : f32
      %198 = vector.broadcast %cst_87 : f32 to vector<2x128xf32>
      %199 = arith.addf %198, %197 : vector<2x128xf32>
      %200 = arith.select %172, %199, %197 : vector<2x128xi1>, vector<2x128xf32>
      %cst_88 = arith.constant 1.57079637 : f32
      %201 = vector.broadcast %cst_88 : f32 to vector<2x128xf32>
      %202 = arith.subf %201, %200 : vector<2x128xf32>
      %203 = arith.select %168, %202, %200 : vector<2x128xi1>, vector<2x128xf32>
      %cst_89 = arith.constant 1.000000e-07 : f32
      %204 = vector.broadcast %cst_89 : f32 to vector<2x128xf32>
      %205 = arith.addf %91, %204 : vector<2x128xf32>
      %206 = tpu.reciprocal %205 {approx = true} : vector<2x128xf32> -> vector<2x128xf32>
      %207 = arith.mulf %89, %206 : vector<2x128xf32>
      %cst_90 = arith.constant 1.000000e+00 : f32
      %208 = vector.broadcast %cst_90 : f32 to vector<2x128xf32>
      %209 = arith.cmpf ogt, %207, %208 : vector<2x128xf32>
      %210 = tpu.reciprocal %207 {approx = true} : vector<2x128xf32> -> vector<2x128xf32>
      %211 = arith.select %209, %210, %207 : vector<2x128xi1>, vector<2x128xf32>
      %cst_91 = arith.constant 0.414213568 : f32
      %212 = vector.broadcast %cst_91 : f32 to vector<2x128xf32>
      %213 = arith.cmpf ogt, %211, %212 : vector<2x128xf32>
      %cst_92 = arith.constant 1.000000e+00 : f32
      %214 = vector.broadcast %cst_92 : f32 to vector<2x128xf32>
      %215 = arith.subf %211, %214 : vector<2x128xf32>
      %cst_93 = arith.constant 1.000000e+00 : f32
      %216 = vector.broadcast %cst_93 : f32 to vector<2x128xf32>
      %217 = arith.addf %211, %216 : vector<2x128xf32>
      %218 = tpu.reciprocal %217 {approx = true} : vector<2x128xf32> -> vector<2x128xf32>
      %219 = arith.mulf %215, %218 : vector<2x128xf32>
      %220 = arith.select %213, %219, %211 : vector<2x128xi1>, vector<2x128xf32>
      %221 = arith.mulf %220, %220 : vector<2x128xf32>
      %cst_94 = arith.constant -0.0909090936 : f32
      %222 = vector.broadcast %cst_94 : f32 to vector<2x128xf32>
      %223 = arith.mulf %221, %222 : vector<2x128xf32>
      %cst_95 = arith.constant 0.111111112 : f32
      %224 = vector.broadcast %cst_95 : f32 to vector<2x128xf32>
      %225 = arith.addf %224, %223 : vector<2x128xf32>
      %226 = arith.mulf %221, %225 : vector<2x128xf32>
      %cst_96 = arith.constant -0.142857149 : f32
      %227 = vector.broadcast %cst_96 : f32 to vector<2x128xf32>
      %228 = arith.addf %227, %226 : vector<2x128xf32>
      %229 = arith.mulf %221, %228 : vector<2x128xf32>
      %cst_97 = arith.constant 2.000000e-01 : f32
      %230 = vector.broadcast %cst_97 : f32 to vector<2x128xf32>
      %231 = arith.addf %230, %229 : vector<2x128xf32>
      %232 = arith.mulf %221, %231 : vector<2x128xf32>
      %cst_98 = arith.constant -0.333333343 : f32
      %233 = vector.broadcast %cst_98 : f32 to vector<2x128xf32>
      %234 = arith.addf %233, %232 : vector<2x128xf32>
      %235 = arith.mulf %221, %234 : vector<2x128xf32>
      %cst_99 = arith.constant 1.000000e+00 : f32
      %236 = vector.broadcast %cst_99 : f32 to vector<2x128xf32>
      %237 = arith.addf %236, %235 : vector<2x128xf32>
      %238 = arith.mulf %220, %237 : vector<2x128xf32>
      %cst_100 = arith.constant 0.785398185 : f32
      %239 = vector.broadcast %cst_100 : f32 to vector<2x128xf32>
      %240 = arith.addf %239, %238 : vector<2x128xf32>
      %241 = arith.select %213, %240, %238 : vector<2x128xi1>, vector<2x128xf32>
      %cst_101 = arith.constant 1.57079637 : f32
      %242 = vector.broadcast %cst_101 : f32 to vector<2x128xf32>
      %243 = arith.subf %242, %241 : vector<2x128xf32>
      %244 = arith.select %209, %243, %241 : vector<2x128xi1>, vector<2x128xf32>
      %245 = arith.subf %203, %244 : vector<2x128xf32>
      %246 = arith.mulf %245, %245 : vector<2x128xf32>
      %cst_102 = arith.constant 0.405284733 : f32
      %247 = vector.broadcast %cst_102 : f32 to vector<2x128xf32>
      %248 = arith.mulf %247, %246 : vector<2x128xf32>
      %249 = arith.subf %248, %140 : vector<2x128xf32>
      %cst_103 = arith.constant 1.00000012 : f32
      %250 = vector.broadcast %cst_103 : f32 to vector<2x128xf32>
      %251 = arith.addf %249, %250 : vector<2x128xf32>
      %252 = tpu.reciprocal %251 {approx = true} : vector<2x128xf32> -> vector<2x128xf32>
      %253 = arith.mulf %248, %252 : vector<2x128xf32>
      %254 = tpu.reciprocal %151 {approx = true} : vector<2x128xf32> -> vector<2x128xf32>
      %255 = arith.mulf %162, %254 : vector<2x128xf32>
      %256 = arith.mulf %248, %253 : vector<2x128xf32>
      %257 = arith.addf %255, %256 : vector<2x128xf32>
      %258 = arith.subf %140, %257 : vector<2x128xf32>
      %cst_104 = arith.constant 1.000000e+00 : f32
      %259 = vector.broadcast %cst_104 : f32 to vector<2x128xf32>
      %260 = arith.subf %259, %258 : vector<2x128xf32>
      %261 = arith.mulf %87, %260 : vector<2x128xf32>
      %cst_105 = arith.constant dense<0.000000e+00> : vector<2xf32>
      %262 = vector.multi_reduction <add>, %261, %cst_105 [1] : vector<2x128xf32> to vector<2xf32>
      %263 = vector.shape_cast %262 : vector<2xf32> to vector<2x1xf32>
      %cst_106 = arith.constant dense<0.000000e+00> : vector<1xf32>
      %264 = vector.multi_reduction <add>, %263, %cst_106 [0] : vector<2x1xf32> to vector<1xf32>
      %265 = vector.shape_cast %264 : vector<1xf32> to vector<1x1xf32>
      %cst_107 = arith.constant dense<0.000000e+00> : vector<2xf32>
      %266 = vector.multi_reduction <add>, %87, %cst_107 [1] : vector<2x128xf32> to vector<2xf32>
      %267 = vector.shape_cast %266 : vector<2xf32> to vector<2x1xf32>
      %cst_108 = arith.constant dense<0.000000e+00> : vector<1xf32>
      %268 = vector.multi_reduction <add>, %267, %cst_108 [0] : vector<2x1xf32> to vector<1xf32>
      %269 = vector.shape_cast %268 : vector<1xf32> to vector<1x1xf32>
      %cst_109 = arith.constant 0.000000e+00 : f32
      %270 = vector.broadcast %cst_109 : f32 to vector<2x128xf32>
      %271 = arith.maximumf %258, %270 : vector<2x128xf32>
      %cst_110 = arith.constant 0.000000e+00 : f32
      %272 = vector.broadcast %cst_110 : f32 to vector<2x128xf32>
      %273 = arith.select %85, %271, %272 : vector<2x128xi1>, vector<2x128xf32>
      %cst_111 = arith.constant 0.000000e+00 : f32
      %274 = vector.broadcast %cst_111 : f32 to vector<2x128xf32>
      %275 = arith.maximumf %6, %274 : vector<2x128xf32>
      %276 = arith.mulf %6, %273 : vector<2x128xf32>
      %277 = arith.subf %275, %276 : vector<2x128xf32>
      %278 = math.absf %6 : vector<2x128xf32>
      %cst_112 = arith.constant 0.000000e+00 : f32
      %279 = vector.broadcast %cst_112 : f32 to vector<2x128xf32>
      %280 = arith.subf %279, %278 : vector<2x128xf32>
      %281 = math.exp %280 : vector<2x128xf32>
      %cst_113 = arith.constant 1.000000e+00 : f32
      %282 = vector.broadcast %cst_113 : f32 to vector<2x128xf32>
      %283 = arith.addf %282, %281 : vector<2x128xf32>
      %284 = math.log %283 : vector<2x128xf32>
      %285 = arith.addf %277, %284 : vector<2x128xf32>
      %cst_114 = arith.constant dense<0.000000e+00> : vector<2xf32>
      %286 = vector.multi_reduction <add>, %285, %cst_114 [1] : vector<2x128xf32> to vector<2xf32>
      %287 = vector.shape_cast %286 : vector<2xf32> to vector<2x1xf32>
      %cst_115 = arith.constant dense<0.000000e+00> : vector<1xf32>
      %288 = vector.multi_reduction <add>, %287, %cst_115 [0] : vector<2x1xf32> to vector<1xf32>
      %289 = vector.shape_cast %288 : vector<1xf32> to vector<1x1xf32>
      %cst_116 = arith.constant 0.000000e+00 : f32
      %290 = vector.broadcast %cst_116 : f32 to vector<2x128xf32>
      %cst_117 = arith.constant 5.000000e-01 : f32
      %291 = vector.broadcast %cst_117 : f32 to vector<2x128xf32>
      %292 = arith.mulf %24, %291 : vector<2x128xf32>
      %293 = math.floor %292 : vector<2x128xf32>
      %cst_118 = arith.constant 2.000000e+00 : f32
      %294 = vector.broadcast %cst_118 : f32 to vector<2x128xf32>
      %295 = arith.mulf %294, %293 : vector<2x128xf32>
      %296 = arith.subf %24, %295 : vector<2x128xf32>
      %c0_119 = arith.constant 0 : index
      %c5_120 = arith.constant 5 : index
      %c0_121 = arith.constant 0 : index
      %c0_122 = arith.constant 0 : index
      %297 = vector.load %arg6[%c0_119, %c5_120, %c0_121, %c0_122] : memref<1x25x2x128xf32, #tpu.memory_space<vmem>>, vector<1x1x2x128xf32>
      %298 = vector.shape_cast %297 : vector<1x1x2x128xf32> to vector<2x128xf32>
      %cst_123 = arith.constant 0.000000e+00 : f32
      %299 = vector.broadcast %cst_123 : f32 to vector<2x128xf32>
      %300 = arith.maximumf %298, %299 : vector<2x128xf32>
      %301 = arith.mulf %298, %296 : vector<2x128xf32>
      %302 = arith.subf %300, %301 : vector<2x128xf32>
      %303 = math.absf %298 : vector<2x128xf32>
      %cst_124 = arith.constant 0.000000e+00 : f32
      %304 = vector.broadcast %cst_124 : f32 to vector<2x128xf32>
      %305 = arith.subf %304, %303 : vector<2x128xf32>
      %306 = math.exp %305 : vector<2x128xf32>
      %cst_125 = arith.constant 1.000000e+00 : f32
      %307 = vector.broadcast %cst_125 : f32 to vector<2x128xf32>
      %308 = arith.addf %307, %306 : vector<2x128xf32>
      %309 = math.log %308 : vector<2x128xf32>
      %310 = arith.addf %302, %309 : vector<2x128xf32>
      %311 = arith.addf %290, %310 : vector<2x128xf32>
      %cst_126 = arith.constant 5.000000e-01 : f32
      %312 = vector.broadcast %cst_126 : f32 to vector<2x128xf32>
      %313 = arith.mulf %293, %312 : vector<2x128xf32>
      %314 = math.floor %313 : vector<2x128xf32>
      %cst_127 = arith.constant 2.000000e+00 : f32
      %315 = vector.broadcast %cst_127 : f32 to vector<2x128xf32>
      %316 = arith.mulf %315, %314 : vector<2x128xf32>
      %317 = arith.subf %293, %316 : vector<2x128xf32>
      %c0_128 = arith.constant 0 : index
      %c6_129 = arith.constant 6 : index
      %c0_130 = arith.constant 0 : index
      %c0_131 = arith.constant 0 : index
      %318 = vector.load %arg6[%c0_128, %c6_129, %c0_130, %c0_131] : memref<1x25x2x128xf32, #tpu.memory_space<vmem>>, vector<1x1x2x128xf32>
      %319 = vector.shape_cast %318 : vector<1x1x2x128xf32> to vector<2x128xf32>
      %cst_132 = arith.constant 0.000000e+00 : f32
      %320 = vector.broadcast %cst_132 : f32 to vector<2x128xf32>
      %321 = arith.maximumf %319, %320 : vector<2x128xf32>
      %322 = arith.mulf %319, %317 : vector<2x128xf32>
      %323 = arith.subf %321, %322 : vector<2x128xf32>
      %324 = math.absf %319 : vector<2x128xf32>
      %cst_133 = arith.constant 0.000000e+00 : f32
      %325 = vector.broadcast %cst_133 : f32 to vector<2x128xf32>
      %326 = arith.subf %325, %324 : vector<2x128xf32>
      %327 = math.exp %326 : vector<2x128xf32>
      %cst_134 = arith.constant 1.000000e+00 : f32
      %328 = vector.broadcast %cst_134 : f32 to vector<2x128xf32>
      %329 = arith.addf %328, %327 : vector<2x128xf32>
      %330 = math.log %329 : vector<2x128xf32>
      %331 = arith.addf %323, %330 : vector<2x128xf32>
      %332 = arith.addf %311, %331 : vector<2x128xf32>
      %cst_135 = arith.constant 5.000000e-01 : f32
      %333 = vector.broadcast %cst_135 : f32 to vector<2x128xf32>
      %334 = arith.mulf %314, %333 : vector<2x128xf32>
      %335 = math.floor %334 : vector<2x128xf32>
      %cst_136 = arith.constant 2.000000e+00 : f32
      %336 = vector.broadcast %cst_136 : f32 to vector<2x128xf32>
      %337 = arith.mulf %336, %335 : vector<2x128xf32>
      %338 = arith.subf %314, %337 : vector<2x128xf32>
      %c0_137 = arith.constant 0 : index
      %c7_138 = arith.constant 7 : index
      %c0_139 = arith.constant 0 : index
      %c0_140 = arith.constant 0 : index
      %339 = vector.load %arg6[%c0_137, %c7_138, %c0_139, %c0_140] : memref<1x25x2x128xf32, #tpu.memory_space<vmem>>, vector<1x1x2x128xf32>
      %340 = vector.shape_cast %339 : vector<1x1x2x128xf32> to vector<2x128xf32>
      %cst_141 = arith.constant 0.000000e+00 : f32
      %341 = vector.broadcast %cst_141 : f32 to vector<2x128xf32>
      %342 = arith.maximumf %340, %341 : vector<2x128xf32>
      %343 = arith.mulf %340, %338 : vector<2x128xf32>
      %344 = arith.subf %342, %343 : vector<2x128xf32>
      %345 = math.absf %340 : vector<2x128xf32>
      %cst_142 = arith.constant 0.000000e+00 : f32
      %346 = vector.broadcast %cst_142 : f32 to vector<2x128xf32>
      %347 = arith.subf %346, %345 : vector<2x128xf32>
      %348 = math.exp %347 : vector<2x128xf32>
      %cst_143 = arith.constant 1.000000e+00 : f32
      %349 = vector.broadcast %cst_143 : f32 to vector<2x128xf32>
      %350 = arith.addf %349, %348 : vector<2x128xf32>
      %351 = math.log %350 : vector<2x128xf32>
      %352 = arith.addf %344, %351 : vector<2x128xf32>
      %353 = arith.addf %332, %352 : vector<2x128xf32>
      %cst_144 = arith.constant 5.000000e-01 : f32
      %354 = vector.broadcast %cst_144 : f32 to vector<2x128xf32>
      %355 = arith.mulf %335, %354 : vector<2x128xf32>
      %356 = math.floor %355 : vector<2x128xf32>
      %cst_145 = arith.constant 2.000000e+00 : f32
      %357 = vector.broadcast %cst_145 : f32 to vector<2x128xf32>
      %358 = arith.mulf %357, %356 : vector<2x128xf32>
      %359 = arith.subf %335, %358 : vector<2x128xf32>
      %c0_146 = arith.constant 0 : index
      %c8 = arith.constant 8 : index
      %c0_147 = arith.constant 0 : index
      %c0_148 = arith.constant 0 : index
      %360 = vector.load %arg6[%c0_146, %c8, %c0_147, %c0_148] : memref<1x25x2x128xf32, #tpu.memory_space<vmem>>, vector<1x1x2x128xf32>
      %361 = vector.shape_cast %360 : vector<1x1x2x128xf32> to vector<2x128xf32>
      %cst_149 = arith.constant 0.000000e+00 : f32
      %362 = vector.broadcast %cst_149 : f32 to vector<2x128xf32>
      %363 = arith.maximumf %361, %362 : vector<2x128xf32>
      %364 = arith.mulf %361, %359 : vector<2x128xf32>
      %365 = arith.subf %363, %364 : vector<2x128xf32>
      %366 = math.absf %361 : vector<2x128xf32>
      %cst_150 = arith.constant 0.000000e+00 : f32
      %367 = vector.broadcast %cst_150 : f32 to vector<2x128xf32>
      %368 = arith.subf %367, %366 : vector<2x128xf32>
      %369 = math.exp %368 : vector<2x128xf32>
      %cst_151 = arith.constant 1.000000e+00 : f32
      %370 = vector.broadcast %cst_151 : f32 to vector<2x128xf32>
      %371 = arith.addf %370, %369 : vector<2x128xf32>
      %372 = math.log %371 : vector<2x128xf32>
      %373 = arith.addf %365, %372 : vector<2x128xf32>
      %374 = arith.addf %353, %373 : vector<2x128xf32>
      %cst_152 = arith.constant 5.000000e-01 : f32
      %375 = vector.broadcast %cst_152 : f32 to vector<2x128xf32>
      %376 = arith.mulf %356, %375 : vector<2x128xf32>
      %377 = math.floor %376 : vector<2x128xf32>
      %cst_153 = arith.constant 2.000000e+00 : f32
      %378 = vector.broadcast %cst_153 : f32 to vector<2x128xf32>
      %379 = arith.mulf %378, %377 : vector<2x128xf32>
      %380 = arith.subf %356, %379 : vector<2x128xf32>
      %c0_154 = arith.constant 0 : index
      %c9 = arith.constant 9 : index
      %c0_155 = arith.constant 0 : index
      %c0_156 = arith.constant 0 : index
      %381 = vector.load %arg6[%c0_154, %c9, %c0_155, %c0_156] : memref<1x25x2x128xf32, #tpu.memory_space<vmem>>, vector<1x1x2x128xf32>
      %382 = vector.shape_cast %381 : vector<1x1x2x128xf32> to vector<2x128xf32>
      %cst_157 = arith.constant 0.000000e+00 : f32
      %383 = vector.broadcast %cst_157 : f32 to vector<2x128xf32>
      %384 = arith.maximumf %382, %383 : vector<2x128xf32>
      %385 = arith.mulf %382, %380 : vector<2x128xf32>
      %386 = arith.subf %384, %385 : vector<2x128xf32>
      %387 = math.absf %382 : vector<2x128xf32>
      %cst_158 = arith.constant 0.000000e+00 : f32
      %388 = vector.broadcast %cst_158 : f32 to vector<2x128xf32>
      %389 = arith.subf %388, %387 : vector<2x128xf32>
      %390 = math.exp %389 : vector<2x128xf32>
      %cst_159 = arith.constant 1.000000e+00 : f32
      %391 = vector.broadcast %cst_159 : f32 to vector<2x128xf32>
      %392 = arith.addf %391, %390 : vector<2x128xf32>
      %393 = math.log %392 : vector<2x128xf32>
      %394 = arith.addf %386, %393 : vector<2x128xf32>
      %395 = arith.addf %374, %394 : vector<2x128xf32>
      %cst_160 = arith.constant 5.000000e-01 : f32
      %396 = vector.broadcast %cst_160 : f32 to vector<2x128xf32>
      %397 = arith.mulf %377, %396 : vector<2x128xf32>
      %398 = math.floor %397 : vector<2x128xf32>
      %cst_161 = arith.constant 2.000000e+00 : f32
      %399 = vector.broadcast %cst_161 : f32 to vector<2x128xf32>
      %400 = arith.mulf %399, %398 : vector<2x128xf32>
      %401 = arith.subf %377, %400 : vector<2x128xf32>
      %c0_162 = arith.constant 0 : index
      %c10 = arith.constant 10 : index
      %c0_163 = arith.constant 0 : index
      %c0_164 = arith.constant 0 : index
      %402 = vector.load %arg6[%c0_162, %c10, %c0_163, %c0_164] : memref<1x25x2x128xf32, #tpu.memory_space<vmem>>, vector<1x1x2x128xf32>
      %403 = vector.shape_cast %402 : vector<1x1x2x128xf32> to vector<2x128xf32>
      %cst_165 = arith.constant 0.000000e+00 : f32
      %404 = vector.broadcast %cst_165 : f32 to vector<2x128xf32>
      %405 = arith.maximumf %403, %404 : vector<2x128xf32>
      %406 = arith.mulf %403, %401 : vector<2x128xf32>
      %407 = arith.subf %405, %406 : vector<2x128xf32>
      %408 = math.absf %403 : vector<2x128xf32>
      %cst_166 = arith.constant 0.000000e+00 : f32
      %409 = vector.broadcast %cst_166 : f32 to vector<2x128xf32>
      %410 = arith.subf %409, %408 : vector<2x128xf32>
      %411 = math.exp %410 : vector<2x128xf32>
      %cst_167 = arith.constant 1.000000e+00 : f32
      %412 = vector.broadcast %cst_167 : f32 to vector<2x128xf32>
      %413 = arith.addf %412, %411 : vector<2x128xf32>
      %414 = math.log %413 : vector<2x128xf32>
      %415 = arith.addf %407, %414 : vector<2x128xf32>
      %416 = arith.addf %395, %415 : vector<2x128xf32>
      %cst_168 = arith.constant 5.000000e-01 : f32
      %417 = vector.broadcast %cst_168 : f32 to vector<2x128xf32>
      %418 = arith.mulf %398, %417 : vector<2x128xf32>
      %419 = math.floor %418 : vector<2x128xf32>
      %cst_169 = arith.constant 2.000000e+00 : f32
      %420 = vector.broadcast %cst_169 : f32 to vector<2x128xf32>
      %421 = arith.mulf %420, %419 : vector<2x128xf32>
      %422 = arith.subf %398, %421 : vector<2x128xf32>
      %c0_170 = arith.constant 0 : index
      %c11 = arith.constant 11 : index
      %c0_171 = arith.constant 0 : index
      %c0_172 = arith.constant 0 : index
      %423 = vector.load %arg6[%c0_170, %c11, %c0_171, %c0_172] : memref<1x25x2x128xf32, #tpu.memory_space<vmem>>, vector<1x1x2x128xf32>
      %424 = vector.shape_cast %423 : vector<1x1x2x128xf32> to vector<2x128xf32>
      %cst_173 = arith.constant 0.000000e+00 : f32
      %425 = vector.broadcast %cst_173 : f32 to vector<2x128xf32>
      %426 = arith.maximumf %424, %425 : vector<2x128xf32>
      %427 = arith.mulf %424, %422 : vector<2x128xf32>
      %428 = arith.subf %426, %427 : vector<2x128xf32>
      %429 = math.absf %424 : vector<2x128xf32>
      %cst_174 = arith.constant 0.000000e+00 : f32
      %430 = vector.broadcast %cst_174 : f32 to vector<2x128xf32>
      %431 = arith.subf %430, %429 : vector<2x128xf32>
      %432 = math.exp %431 : vector<2x128xf32>
      %cst_175 = arith.constant 1.000000e+00 : f32
      %433 = vector.broadcast %cst_175 : f32 to vector<2x128xf32>
      %434 = arith.addf %433, %432 : vector<2x128xf32>
      %435 = math.log %434 : vector<2x128xf32>
      %436 = arith.addf %428, %435 : vector<2x128xf32>
      %437 = arith.addf %416, %436 : vector<2x128xf32>
      %cst_176 = arith.constant 5.000000e-01 : f32
      %438 = vector.broadcast %cst_176 : f32 to vector<2x128xf32>
      %439 = arith.mulf %419, %438 : vector<2x128xf32>
      %440 = math.floor %439 : vector<2x128xf32>
      %cst_177 = arith.constant 2.000000e+00 : f32
      %441 = vector.broadcast %cst_177 : f32 to vector<2x128xf32>
      %442 = arith.mulf %441, %440 : vector<2x128xf32>
      %443 = arith.subf %419, %442 : vector<2x128xf32>
      %c0_178 = arith.constant 0 : index
      %c12 = arith.constant 12 : index
      %c0_179 = arith.constant 0 : index
      %c0_180 = arith.constant 0 : index
      %444 = vector.load %arg6[%c0_178, %c12, %c0_179, %c0_180] : memref<1x25x2x128xf32, #tpu.memory_space<vmem>>, vector<1x1x2x128xf32>
      %445 = vector.shape_cast %444 : vector<1x1x2x128xf32> to vector<2x128xf32>
      %cst_181 = arith.constant 0.000000e+00 : f32
      %446 = vector.broadcast %cst_181 : f32 to vector<2x128xf32>
      %447 = arith.maximumf %445, %446 : vector<2x128xf32>
      %448 = arith.mulf %445, %443 : vector<2x128xf32>
      %449 = arith.subf %447, %448 : vector<2x128xf32>
      %450 = math.absf %445 : vector<2x128xf32>
      %cst_182 = arith.constant 0.000000e+00 : f32
      %451 = vector.broadcast %cst_182 : f32 to vector<2x128xf32>
      %452 = arith.subf %451, %450 : vector<2x128xf32>
      %453 = math.exp %452 : vector<2x128xf32>
      %cst_183 = arith.constant 1.000000e+00 : f32
      %454 = vector.broadcast %cst_183 : f32 to vector<2x128xf32>
      %455 = arith.addf %454, %453 : vector<2x128xf32>
      %456 = math.log %455 : vector<2x128xf32>
      %457 = arith.addf %449, %456 : vector<2x128xf32>
      %458 = arith.addf %437, %457 : vector<2x128xf32>
      %cst_184 = arith.constant 5.000000e-01 : f32
      %459 = vector.broadcast %cst_184 : f32 to vector<2x128xf32>
      %460 = arith.mulf %440, %459 : vector<2x128xf32>
      %461 = math.floor %460 : vector<2x128xf32>
      %cst_185 = arith.constant 2.000000e+00 : f32
      %462 = vector.broadcast %cst_185 : f32 to vector<2x128xf32>
      %463 = arith.mulf %462, %461 : vector<2x128xf32>
      %464 = arith.subf %440, %463 : vector<2x128xf32>
      %c0_186 = arith.constant 0 : index
      %c13 = arith.constant 13 : index
      %c0_187 = arith.constant 0 : index
      %c0_188 = arith.constant 0 : index
      %465 = vector.load %arg6[%c0_186, %c13, %c0_187, %c0_188] : memref<1x25x2x128xf32, #tpu.memory_space<vmem>>, vector<1x1x2x128xf32>
      %466 = vector.shape_cast %465 : vector<1x1x2x128xf32> to vector<2x128xf32>
      %cst_189 = arith.constant 0.000000e+00 : f32
      %467 = vector.broadcast %cst_189 : f32 to vector<2x128xf32>
      %468 = arith.maximumf %466, %467 : vector<2x128xf32>
      %469 = arith.mulf %466, %464 : vector<2x128xf32>
      %470 = arith.subf %468, %469 : vector<2x128xf32>
      %471 = math.absf %466 : vector<2x128xf32>
      %cst_190 = arith.constant 0.000000e+00 : f32
      %472 = vector.broadcast %cst_190 : f32 to vector<2x128xf32>
      %473 = arith.subf %472, %471 : vector<2x128xf32>
      %474 = math.exp %473 : vector<2x128xf32>
      %cst_191 = arith.constant 1.000000e+00 : f32
      %475 = vector.broadcast %cst_191 : f32 to vector<2x128xf32>
      %476 = arith.addf %475, %474 : vector<2x128xf32>
      %477 = math.log %476 : vector<2x128xf32>
      %478 = arith.addf %470, %477 : vector<2x128xf32>
      %479 = arith.addf %458, %478 : vector<2x128xf32>
      %cst_192 = arith.constant 5.000000e-01 : f32
      %480 = vector.broadcast %cst_192 : f32 to vector<2x128xf32>
      %481 = arith.mulf %461, %480 : vector<2x128xf32>
      %482 = math.floor %481 : vector<2x128xf32>
      %cst_193 = arith.constant 2.000000e+00 : f32
      %483 = vector.broadcast %cst_193 : f32 to vector<2x128xf32>
      %484 = arith.mulf %483, %482 : vector<2x128xf32>
      %485 = arith.subf %461, %484 : vector<2x128xf32>
      %c0_194 = arith.constant 0 : index
      %c14 = arith.constant 14 : index
      %c0_195 = arith.constant 0 : index
      %c0_196 = arith.constant 0 : index
      %486 = vector.load %arg6[%c0_194, %c14, %c0_195, %c0_196] : memref<1x25x2x128xf32, #tpu.memory_space<vmem>>, vector<1x1x2x128xf32>
      %487 = vector.shape_cast %486 : vector<1x1x2x128xf32> to vector<2x128xf32>
      %cst_197 = arith.constant 0.000000e+00 : f32
      %488 = vector.broadcast %cst_197 : f32 to vector<2x128xf32>
      %489 = arith.maximumf %487, %488 : vector<2x128xf32>
      %490 = arith.mulf %487, %485 : vector<2x128xf32>
      %491 = arith.subf %489, %490 : vector<2x128xf32>
      %492 = math.absf %487 : vector<2x128xf32>
      %cst_198 = arith.constant 0.000000e+00 : f32
      %493 = vector.broadcast %cst_198 : f32 to vector<2x128xf32>
      %494 = arith.subf %493, %492 : vector<2x128xf32>
      %495 = math.exp %494 : vector<2x128xf32>
      %cst_199 = arith.constant 1.000000e+00 : f32
      %496 = vector.broadcast %cst_199 : f32 to vector<2x128xf32>
      %497 = arith.addf %496, %495 : vector<2x128xf32>
      %498 = math.log %497 : vector<2x128xf32>
      %499 = arith.addf %491, %498 : vector<2x128xf32>
      %500 = arith.addf %479, %499 : vector<2x128xf32>
      %cst_200 = arith.constant 5.000000e-01 : f32
      %501 = vector.broadcast %cst_200 : f32 to vector<2x128xf32>
      %502 = arith.mulf %482, %501 : vector<2x128xf32>
      %503 = math.floor %502 : vector<2x128xf32>
      %cst_201 = arith.constant 2.000000e+00 : f32
      %504 = vector.broadcast %cst_201 : f32 to vector<2x128xf32>
      %505 = arith.mulf %504, %503 : vector<2x128xf32>
      %506 = arith.subf %482, %505 : vector<2x128xf32>
      %c0_202 = arith.constant 0 : index
      %c15 = arith.constant 15 : index
      %c0_203 = arith.constant 0 : index
      %c0_204 = arith.constant 0 : index
      %507 = vector.load %arg6[%c0_202, %c15, %c0_203, %c0_204] : memref<1x25x2x128xf32, #tpu.memory_space<vmem>>, vector<1x1x2x128xf32>
      %508 = vector.shape_cast %507 : vector<1x1x2x128xf32> to vector<2x128xf32>
      %cst_205 = arith.constant 0.000000e+00 : f32
      %509 = vector.broadcast %cst_205 : f32 to vector<2x128xf32>
      %510 = arith.maximumf %508, %509 : vector<2x128xf32>
      %511 = arith.mulf %508, %506 : vector<2x128xf32>
      %512 = arith.subf %510, %511 : vector<2x128xf32>
      %513 = math.absf %508 : vector<2x128xf32>
      %cst_206 = arith.constant 0.000000e+00 : f32
      %514 = vector.broadcast %cst_206 : f32 to vector<2x128xf32>
      %515 = arith.subf %514, %513 : vector<2x128xf32>
      %516 = math.exp %515 : vector<2x128xf32>
      %cst_207 = arith.constant 1.000000e+00 : f32
      %517 = vector.broadcast %cst_207 : f32 to vector<2x128xf32>
      %518 = arith.addf %517, %516 : vector<2x128xf32>
      %519 = math.log %518 : vector<2x128xf32>
      %520 = arith.addf %512, %519 : vector<2x128xf32>
      %521 = arith.addf %500, %520 : vector<2x128xf32>
      %cst_208 = arith.constant 5.000000e-01 : f32
      %522 = vector.broadcast %cst_208 : f32 to vector<2x128xf32>
      %523 = arith.mulf %503, %522 : vector<2x128xf32>
      %524 = math.floor %523 : vector<2x128xf32>
      %cst_209 = arith.constant 2.000000e+00 : f32
      %525 = vector.broadcast %cst_209 : f32 to vector<2x128xf32>
      %526 = arith.mulf %525, %524 : vector<2x128xf32>
      %527 = arith.subf %503, %526 : vector<2x128xf32>
      %c0_210 = arith.constant 0 : index
      %c16 = arith.constant 16 : index
      %c0_211 = arith.constant 0 : index
      %c0_212 = arith.constant 0 : index
      %528 = vector.load %arg6[%c0_210, %c16, %c0_211, %c0_212] : memref<1x25x2x128xf32, #tpu.memory_space<vmem>>, vector<1x1x2x128xf32>
      %529 = vector.shape_cast %528 : vector<1x1x2x128xf32> to vector<2x128xf32>
      %cst_213 = arith.constant 0.000000e+00 : f32
      %530 = vector.broadcast %cst_213 : f32 to vector<2x128xf32>
      %531 = arith.maximumf %529, %530 : vector<2x128xf32>
      %532 = arith.mulf %529, %527 : vector<2x128xf32>
      %533 = arith.subf %531, %532 : vector<2x128xf32>
      %534 = math.absf %529 : vector<2x128xf32>
      %cst_214 = arith.constant 0.000000e+00 : f32
      %535 = vector.broadcast %cst_214 : f32 to vector<2x128xf32>
      %536 = arith.subf %535, %534 : vector<2x128xf32>
      %537 = math.exp %536 : vector<2x128xf32>
      %cst_215 = arith.constant 1.000000e+00 : f32
      %538 = vector.broadcast %cst_215 : f32 to vector<2x128xf32>
      %539 = arith.addf %538, %537 : vector<2x128xf32>
      %540 = math.log %539 : vector<2x128xf32>
      %541 = arith.addf %533, %540 : vector<2x128xf32>
      %542 = arith.addf %521, %541 : vector<2x128xf32>
      %cst_216 = arith.constant 5.000000e-01 : f32
      %543 = vector.broadcast %cst_216 : f32 to vector<2x128xf32>
      %544 = arith.mulf %524, %543 : vector<2x128xf32>
      %545 = math.floor %544 : vector<2x128xf32>
      %cst_217 = arith.constant 2.000000e+00 : f32
      %546 = vector.broadcast %cst_217 : f32 to vector<2x128xf32>
      %547 = arith.mulf %546, %545 : vector<2x128xf32>
      %548 = arith.subf %524, %547 : vector<2x128xf32>
      %c0_218 = arith.constant 0 : index
      %c17 = arith.constant 17 : index
      %c0_219 = arith.constant 0 : index
      %c0_220 = arith.constant 0 : index
      %549 = vector.load %arg6[%c0_218, %c17, %c0_219, %c0_220] : memref<1x25x2x128xf32, #tpu.memory_space<vmem>>, vector<1x1x2x128xf32>
      %550 = vector.shape_cast %549 : vector<1x1x2x128xf32> to vector<2x128xf32>
      %cst_221 = arith.constant 0.000000e+00 : f32
      %551 = vector.broadcast %cst_221 : f32 to vector<2x128xf32>
      %552 = arith.maximumf %550, %551 : vector<2x128xf32>
      %553 = arith.mulf %550, %548 : vector<2x128xf32>
      %554 = arith.subf %552, %553 : vector<2x128xf32>
      %555 = math.absf %550 : vector<2x128xf32>
      %cst_222 = arith.constant 0.000000e+00 : f32
      %556 = vector.broadcast %cst_222 : f32 to vector<2x128xf32>
      %557 = arith.subf %556, %555 : vector<2x128xf32>
      %558 = math.exp %557 : vector<2x128xf32>
      %cst_223 = arith.constant 1.000000e+00 : f32
      %559 = vector.broadcast %cst_223 : f32 to vector<2x128xf32>
      %560 = arith.addf %559, %558 : vector<2x128xf32>
      %561 = math.log %560 : vector<2x128xf32>
      %562 = arith.addf %554, %561 : vector<2x128xf32>
      %563 = arith.addf %542, %562 : vector<2x128xf32>
      %cst_224 = arith.constant 5.000000e-01 : f32
      %564 = vector.broadcast %cst_224 : f32 to vector<2x128xf32>
      %565 = arith.mulf %545, %564 : vector<2x128xf32>
      %566 = math.floor %565 : vector<2x128xf32>
      %cst_225 = arith.constant 2.000000e+00 : f32
      %567 = vector.broadcast %cst_225 : f32 to vector<2x128xf32>
      %568 = arith.mulf %567, %566 : vector<2x128xf32>
      %569 = arith.subf %545, %568 : vector<2x128xf32>
      %c0_226 = arith.constant 0 : index
      %c18 = arith.constant 18 : index
      %c0_227 = arith.constant 0 : index
      %c0_228 = arith.constant 0 : index
      %570 = vector.load %arg6[%c0_226, %c18, %c0_227, %c0_228] : memref<1x25x2x128xf32, #tpu.memory_space<vmem>>, vector<1x1x2x128xf32>
      %571 = vector.shape_cast %570 : vector<1x1x2x128xf32> to vector<2x128xf32>
      %cst_229 = arith.constant 0.000000e+00 : f32
      %572 = vector.broadcast %cst_229 : f32 to vector<2x128xf32>
      %573 = arith.maximumf %571, %572 : vector<2x128xf32>
      %574 = arith.mulf %571, %569 : vector<2x128xf32>
      %575 = arith.subf %573, %574 : vector<2x128xf32>
      %576 = math.absf %571 : vector<2x128xf32>
      %cst_230 = arith.constant 0.000000e+00 : f32
      %577 = vector.broadcast %cst_230 : f32 to vector<2x128xf32>
      %578 = arith.subf %577, %576 : vector<2x128xf32>
      %579 = math.exp %578 : vector<2x128xf32>
      %cst_231 = arith.constant 1.000000e+00 : f32
      %580 = vector.broadcast %cst_231 : f32 to vector<2x128xf32>
      %581 = arith.addf %580, %579 : vector<2x128xf32>
      %582 = math.log %581 : vector<2x128xf32>
      %583 = arith.addf %575, %582 : vector<2x128xf32>
      %584 = arith.addf %563, %583 : vector<2x128xf32>
      %cst_232 = arith.constant 5.000000e-01 : f32
      %585 = vector.broadcast %cst_232 : f32 to vector<2x128xf32>
      %586 = arith.mulf %566, %585 : vector<2x128xf32>
      %587 = math.floor %586 : vector<2x128xf32>
      %cst_233 = arith.constant 2.000000e+00 : f32
      %588 = vector.broadcast %cst_233 : f32 to vector<2x128xf32>
      %589 = arith.mulf %588, %587 : vector<2x128xf32>
      %590 = arith.subf %566, %589 : vector<2x128xf32>
      %c0_234 = arith.constant 0 : index
      %c19 = arith.constant 19 : index
      %c0_235 = arith.constant 0 : index
      %c0_236 = arith.constant 0 : index
      %591 = vector.load %arg6[%c0_234, %c19, %c0_235, %c0_236] : memref<1x25x2x128xf32, #tpu.memory_space<vmem>>, vector<1x1x2x128xf32>
      %592 = vector.shape_cast %591 : vector<1x1x2x128xf32> to vector<2x128xf32>
      %cst_237 = arith.constant 0.000000e+00 : f32
      %593 = vector.broadcast %cst_237 : f32 to vector<2x128xf32>
      %594 = arith.maximumf %592, %593 : vector<2x128xf32>
      %595 = arith.mulf %592, %590 : vector<2x128xf32>
      %596 = arith.subf %594, %595 : vector<2x128xf32>
      %597 = math.absf %592 : vector<2x128xf32>
      %cst_238 = arith.constant 0.000000e+00 : f32
      %598 = vector.broadcast %cst_238 : f32 to vector<2x128xf32>
      %599 = arith.subf %598, %597 : vector<2x128xf32>
      %600 = math.exp %599 : vector<2x128xf32>
      %cst_239 = arith.constant 1.000000e+00 : f32
      %601 = vector.broadcast %cst_239 : f32 to vector<2x128xf32>
      %602 = arith.addf %601, %600 : vector<2x128xf32>
      %603 = math.log %602 : vector<2x128xf32>
      %604 = arith.addf %596, %603 : vector<2x128xf32>
      %605 = arith.addf %584, %604 : vector<2x128xf32>
      %cst_240 = arith.constant 5.000000e-01 : f32
      %606 = vector.broadcast %cst_240 : f32 to vector<2x128xf32>
      %607 = arith.mulf %587, %606 : vector<2x128xf32>
      %608 = math.floor %607 : vector<2x128xf32>
      %cst_241 = arith.constant 2.000000e+00 : f32
      %609 = vector.broadcast %cst_241 : f32 to vector<2x128xf32>
      %610 = arith.mulf %609, %608 : vector<2x128xf32>
      %611 = arith.subf %587, %610 : vector<2x128xf32>
      %c0_242 = arith.constant 0 : index
      %c20 = arith.constant 20 : index
      %c0_243 = arith.constant 0 : index
      %c0_244 = arith.constant 0 : index
      %612 = vector.load %arg6[%c0_242, %c20, %c0_243, %c0_244] : memref<1x25x2x128xf32, #tpu.memory_space<vmem>>, vector<1x1x2x128xf32>
      %613 = vector.shape_cast %612 : vector<1x1x2x128xf32> to vector<2x128xf32>
      %cst_245 = arith.constant 0.000000e+00 : f32
      %614 = vector.broadcast %cst_245 : f32 to vector<2x128xf32>
      %615 = arith.maximumf %613, %614 : vector<2x128xf32>
      %616 = arith.mulf %613, %611 : vector<2x128xf32>
      %617 = arith.subf %615, %616 : vector<2x128xf32>
      %618 = math.absf %613 : vector<2x128xf32>
      %cst_246 = arith.constant 0.000000e+00 : f32
      %619 = vector.broadcast %cst_246 : f32 to vector<2x128xf32>
      %620 = arith.subf %619, %618 : vector<2x128xf32>
      %621 = math.exp %620 : vector<2x128xf32>
      %cst_247 = arith.constant 1.000000e+00 : f32
      %622 = vector.broadcast %cst_247 : f32 to vector<2x128xf32>
      %623 = arith.addf %622, %621 : vector<2x128xf32>
      %624 = math.log %623 : vector<2x128xf32>
      %625 = arith.addf %617, %624 : vector<2x128xf32>
      %626 = arith.addf %605, %625 : vector<2x128xf32>
      %cst_248 = arith.constant 5.000000e-01 : f32
      %627 = vector.broadcast %cst_248 : f32 to vector<2x128xf32>
      %628 = arith.mulf %608, %627 : vector<2x128xf32>
      %629 = math.floor %628 : vector<2x128xf32>
      %cst_249 = arith.constant 2.000000e+00 : f32
      %630 = vector.broadcast %cst_249 : f32 to vector<2x128xf32>
      %631 = arith.mulf %630, %629 : vector<2x128xf32>
      %632 = arith.subf %608, %631 : vector<2x128xf32>
      %c0_250 = arith.constant 0 : index
      %c21 = arith.constant 21 : index
      %c0_251 = arith.constant 0 : index
      %c0_252 = arith.constant 0 : index
      %633 = vector.load %arg6[%c0_250, %c21, %c0_251, %c0_252] : memref<1x25x2x128xf32, #tpu.memory_space<vmem>>, vector<1x1x2x128xf32>
      %634 = vector.shape_cast %633 : vector<1x1x2x128xf32> to vector<2x128xf32>
      %cst_253 = arith.constant 0.000000e+00 : f32
      %635 = vector.broadcast %cst_253 : f32 to vector<2x128xf32>
      %636 = arith.maximumf %634, %635 : vector<2x128xf32>
      %637 = arith.mulf %634, %632 : vector<2x128xf32>
      %638 = arith.subf %636, %637 : vector<2x128xf32>
      %639 = math.absf %634 : vector<2x128xf32>
      %cst_254 = arith.constant 0.000000e+00 : f32
      %640 = vector.broadcast %cst_254 : f32 to vector<2x128xf32>
      %641 = arith.subf %640, %639 : vector<2x128xf32>
      %642 = math.exp %641 : vector<2x128xf32>
      %cst_255 = arith.constant 1.000000e+00 : f32
      %643 = vector.broadcast %cst_255 : f32 to vector<2x128xf32>
      %644 = arith.addf %643, %642 : vector<2x128xf32>
      %645 = math.log %644 : vector<2x128xf32>
      %646 = arith.addf %638, %645 : vector<2x128xf32>
      %647 = arith.addf %626, %646 : vector<2x128xf32>
      %cst_256 = arith.constant 5.000000e-01 : f32
      %648 = vector.broadcast %cst_256 : f32 to vector<2x128xf32>
      %649 = arith.mulf %629, %648 : vector<2x128xf32>
      %650 = math.floor %649 : vector<2x128xf32>
      %cst_257 = arith.constant 2.000000e+00 : f32
      %651 = vector.broadcast %cst_257 : f32 to vector<2x128xf32>
      %652 = arith.mulf %651, %650 : vector<2x128xf32>
      %653 = arith.subf %629, %652 : vector<2x128xf32>
      %c0_258 = arith.constant 0 : index
      %c22 = arith.constant 22 : index
      %c0_259 = arith.constant 0 : index
      %c0_260 = arith.constant 0 : index
      %654 = vector.load %arg6[%c0_258, %c22, %c0_259, %c0_260] : memref<1x25x2x128xf32, #tpu.memory_space<vmem>>, vector<1x1x2x128xf32>
      %655 = vector.shape_cast %654 : vector<1x1x2x128xf32> to vector<2x128xf32>
      %cst_261 = arith.constant 0.000000e+00 : f32
      %656 = vector.broadcast %cst_261 : f32 to vector<2x128xf32>
      %657 = arith.maximumf %655, %656 : vector<2x128xf32>
      %658 = arith.mulf %655, %653 : vector<2x128xf32>
      %659 = arith.subf %657, %658 : vector<2x128xf32>
      %660 = math.absf %655 : vector<2x128xf32>
      %cst_262 = arith.constant 0.000000e+00 : f32
      %661 = vector.broadcast %cst_262 : f32 to vector<2x128xf32>
      %662 = arith.subf %661, %660 : vector<2x128xf32>
      %663 = math.exp %662 : vector<2x128xf32>
      %cst_263 = arith.constant 1.000000e+00 : f32
      %664 = vector.broadcast %cst_263 : f32 to vector<2x128xf32>
      %665 = arith.addf %664, %663 : vector<2x128xf32>
      %666 = math.log %665 : vector<2x128xf32>
      %667 = arith.addf %659, %666 : vector<2x128xf32>
      %668 = arith.addf %647, %667 : vector<2x128xf32>
      %cst_264 = arith.constant 5.000000e-01 : f32
      %669 = vector.broadcast %cst_264 : f32 to vector<2x128xf32>
      %670 = arith.mulf %650, %669 : vector<2x128xf32>
      %671 = math.floor %670 : vector<2x128xf32>
      %cst_265 = arith.constant 2.000000e+00 : f32
      %672 = vector.broadcast %cst_265 : f32 to vector<2x128xf32>
      %673 = arith.mulf %672, %671 : vector<2x128xf32>
      %674 = arith.subf %650, %673 : vector<2x128xf32>
      %c0_266 = arith.constant 0 : index
      %c23 = arith.constant 23 : index
      %c0_267 = arith.constant 0 : index
      %c0_268 = arith.constant 0 : index
      %675 = vector.load %arg6[%c0_266, %c23, %c0_267, %c0_268] : memref<1x25x2x128xf32, #tpu.memory_space<vmem>>, vector<1x1x2x128xf32>
      %676 = vector.shape_cast %675 : vector<1x1x2x128xf32> to vector<2x128xf32>
      %cst_269 = arith.constant 0.000000e+00 : f32
      %677 = vector.broadcast %cst_269 : f32 to vector<2x128xf32>
      %678 = arith.maximumf %676, %677 : vector<2x128xf32>
      %679 = arith.mulf %676, %674 : vector<2x128xf32>
      %680 = arith.subf %678, %679 : vector<2x128xf32>
      %681 = math.absf %676 : vector<2x128xf32>
      %cst_270 = arith.constant 0.000000e+00 : f32
      %682 = vector.broadcast %cst_270 : f32 to vector<2x128xf32>
      %683 = arith.subf %682, %681 : vector<2x128xf32>
      %684 = math.exp %683 : vector<2x128xf32>
      %cst_271 = arith.constant 1.000000e+00 : f32
      %685 = vector.broadcast %cst_271 : f32 to vector<2x128xf32>
      %686 = arith.addf %685, %684 : vector<2x128xf32>
      %687 = math.log %686 : vector<2x128xf32>
      %688 = arith.addf %680, %687 : vector<2x128xf32>
      %689 = arith.addf %668, %688 : vector<2x128xf32>
      %cst_272 = arith.constant 5.000000e-01 : f32
      %690 = vector.broadcast %cst_272 : f32 to vector<2x128xf32>
      %691 = arith.mulf %671, %690 : vector<2x128xf32>
      %692 = math.floor %691 : vector<2x128xf32>
      %cst_273 = arith.constant 2.000000e+00 : f32
      %693 = vector.broadcast %cst_273 : f32 to vector<2x128xf32>
      %694 = arith.mulf %693, %692 : vector<2x128xf32>
      %695 = arith.subf %671, %694 : vector<2x128xf32>
      %c0_274 = arith.constant 0 : index
      %c24 = arith.constant 24 : index
      %c0_275 = arith.constant 0 : index
      %c0_276 = arith.constant 0 : index
      %696 = vector.load %arg6[%c0_274, %c24, %c0_275, %c0_276] : memref<1x25x2x128xf32, #tpu.memory_space<vmem>>, vector<1x1x2x128xf32>
      %697 = vector.shape_cast %696 : vector<1x1x2x128xf32> to vector<2x128xf32>
      %cst_277 = arith.constant 0.000000e+00 : f32
      %698 = vector.broadcast %cst_277 : f32 to vector<2x128xf32>
      %699 = arith.maximumf %697, %698 : vector<2x128xf32>
      %700 = arith.mulf %697, %695 : vector<2x128xf32>
      %701 = arith.subf %699, %700 : vector<2x128xf32>
      %702 = math.absf %697 : vector<2x128xf32>
      %cst_278 = arith.constant 0.000000e+00 : f32
      %703 = vector.broadcast %cst_278 : f32 to vector<2x128xf32>
      %704 = arith.subf %703, %702 : vector<2x128xf32>
      %705 = math.exp %704 : vector<2x128xf32>
      %cst_279 = arith.constant 1.000000e+00 : f32
      %706 = vector.broadcast %cst_279 : f32 to vector<2x128xf32>
      %707 = arith.addf %706, %705 : vector<2x128xf32>
      %708 = math.log %707 : vector<2x128xf32>
      %709 = arith.addf %701, %708 : vector<2x128xf32>
      %710 = arith.addf %689, %709 : vector<2x128xf32>
      %711 = arith.mulf %87, %710 : vector<2x128xf32>
      %cst_280 = arith.constant dense<0.000000e+00> : vector<2xf32>
      %712 = vector.multi_reduction <add>, %711, %cst_280 [1] : vector<2x128xf32> to vector<2xf32>
      %713 = vector.shape_cast %712 : vector<2xf32> to vector<2x1xf32>
      %cst_281 = arith.constant dense<0.000000e+00> : vector<1xf32>
      %714 = vector.multi_reduction <add>, %713, %cst_281 [0] : vector<2x1xf32> to vector<1xf32>
      %715 = vector.shape_cast %714 : vector<1xf32> to vector<1x1xf32>
      %c0_i32_282 = arith.constant 0 : i32
      %716 = vector.broadcast %c0_i32_282 : i32 to vector<1x128xi32>
      %717 = arith.cmpi eq, %4, %716 : vector<1x128xi32>
      %cst_283 = arith.constant 0.000000e+00 : f32
      %718 = vector.shape_cast %265 : vector<1x1xf32> to vector<1x1xf32>
      %719 = vector.broadcast %718 : vector<1x1xf32> to vector<1x128xf32>
      %720 = vector.broadcast %cst_283 : f32 to vector<1x128xf32>
      %721 = arith.select %717, %719, %720 : vector<1x128xi1>, vector<1x128xf32>
      %c1_i32_284 = arith.constant 1 : i32
      %722 = vector.broadcast %c1_i32_284 : i32 to vector<1x128xi32>
      %723 = arith.cmpi eq, %4, %722 : vector<1x128xi32>
      %cst_285 = arith.constant 0.000000e+00 : f32
      %724 = vector.shape_cast %269 : vector<1x1xf32> to vector<1x1xf32>
      %725 = vector.broadcast %724 : vector<1x1xf32> to vector<1x128xf32>
      %726 = vector.broadcast %cst_285 : f32 to vector<1x128xf32>
      %727 = arith.select %723, %725, %726 : vector<1x128xi1>, vector<1x128xf32>
      %728 = arith.addf %721, %727 : vector<1x128xf32>
      %c2_i32_286 = arith.constant 2 : i32
      %729 = vector.broadcast %c2_i32_286 : i32 to vector<1x128xi32>
      %730 = arith.cmpi eq, %4, %729 : vector<1x128xi32>
      %cst_287 = arith.constant 0.000000e+00 : f32
      %731 = vector.shape_cast %289 : vector<1x1xf32> to vector<1x1xf32>
      %732 = vector.broadcast %731 : vector<1x1xf32> to vector<1x128xf32>
      %733 = vector.broadcast %cst_287 : f32 to vector<1x128xf32>
      %734 = arith.select %730, %732, %733 : vector<1x128xi1>, vector<1x128xf32>
      %735 = arith.addf %728, %734 : vector<1x128xf32>
      %c3_i32 = arith.constant 3 : i32
      %736 = vector.broadcast %c3_i32 : i32 to vector<1x128xi32>
      %737 = arith.cmpi eq, %4, %736 : vector<1x128xi32>
      %cst_288 = arith.constant 0.000000e+00 : f32
      %738 = vector.shape_cast %715 : vector<1x1xf32> to vector<1x1xf32>
      %739 = vector.broadcast %738 : vector<1x1xf32> to vector<1x128xf32>
      %740 = vector.broadcast %cst_288 : f32 to vector<1x128xf32>
      %741 = arith.select %737, %739, %740 : vector<1x128xi1>, vector<1x128xf32>
      %742 = arith.addf %735, %741 : vector<1x128xf32>
      %c0_289 = arith.constant 0 : index
      %c0_290 = arith.constant 0 : index
      %c0_291 = arith.constant 0 : index
      %743 = vector.load %arg8[%c0_289, %c0_290, %c0_291] : memref<1x1x128xf32, #tpu.memory_space<vmem>>, vector<1x1x128xf32>
      %744 = vector.shape_cast %743 : vector<1x1x128xf32> to vector<1x128xf32>
      %745 = vector.shape_cast %742 : vector<1x128xf32> to vector<1x1x128xf32>
      tpu.vector_store %arg8[%c0_289, %c0_290, %c0_291], %745 {strides = array<i32>} : memref<1x1x128xf32, #tpu.memory_space<vmem>>, vector<1x1x128xf32>,
    } else {
    }
    return
  }
  func.func @transform_0(%arg0: i32, %arg1: i32, %arg2: memref<6xi32, #tpu.memory_space<smem>>, %arg3: memref<6xi32, #tpu.memory_space<smem>>, %arg4: memref<6xi32, #tpu.memory_space<smem>>) -> (i32, i32, i32, i32) {
    %c4_i32 = arith.constant 4 : i32
    %c0_i32 = arith.constant 0 : i32
    %c0_i32_0 = arith.constant 0 : i32
    return %arg0, %c4_i32, %arg1, %c0_i32 : i32, i32, i32, i32
  }
  func.func @transform_1(%arg0: i32, %arg1: i32, %arg2: memref<6xi32, #tpu.memory_space<smem>>, %arg3: memref<6xi32, #tpu.memory_space<smem>>, %arg4: memref<6xi32, #tpu.memory_space<smem>>) -> (i32, i32, i32, i32) {
    %c1_i32 = arith.constant 1 : i32
    %0 = arith.muli %arg0, %c1_i32 : i32
    %1 = arith.addi %0, %arg1 : i32
    %2 = arith.index_cast %1 : i32 to index
    %3 = memref.load %arg3[%2] : memref<6xi32, #tpu.memory_space<smem>>
    %c1_i32_0 = arith.constant 1 : i32
    %4 = arith.muli %arg0, %c1_i32_0 : i32
    %5 = arith.addi %4, %arg1 : i32
    %6 = arith.index_cast %5 : i32 to index
    %7 = memref.load %arg4[%6] : memref<6xi32, #tpu.memory_space<smem>>
    %c0_i32 = arith.constant 0 : i32
    %c0_i32_1 = arith.constant 0 : i32
    %c0_i32_2 = arith.constant 0 : i32
    return %3, %c0_i32, %7, %c0_i32_1 : i32, i32, i32, i32
  }
  func.func @transform_2(%arg0: i32, %arg1: i32, %arg2: memref<6xi32, #tpu.memory_space<smem>>, %arg3: memref<6xi32, #tpu.memory_space<smem>>, %arg4: memref<6xi32, #tpu.memory_space<smem>>) -> (i32, i32, i32, i32) {
    %c1_i32 = arith.constant 1 : i32
    %0 = arith.muli %arg0, %c1_i32 : i32
    %1 = arith.addi %0, %arg1 : i32
    %2 = arith.index_cast %1 : i32 to index
    %3 = memref.load %arg3[%2] : memref<6xi32, #tpu.memory_space<smem>>
    %c1_i32_0 = arith.constant 1 : i32
    %4 = arith.muli %arg0, %c1_i32_0 : i32
    %5 = arith.addi %4, %arg1 : i32
    %6 = arith.index_cast %5 : i32 to index
    %7 = memref.load %arg4[%6] : memref<6xi32, #tpu.memory_space<smem>>
    %c0_i32 = arith.constant 0 : i32
    %c0_i32_1 = arith.constant 0 : i32
    %c0_i32_2 = arith.constant 0 : i32
    return %3, %c0_i32, %7, %c0_i32_1 : i32, i32, i32, i32
  }
  func.func @transform_3(%arg0: i32, %arg1: i32, %arg2: memref<6xi32, #tpu.memory_space<smem>>, %arg3: memref<6xi32, #tpu.memory_space<smem>>, %arg4: memref<6xi32, #tpu.memory_space<smem>>) -> (i32, i32, i32) {
    %c1_i32 = arith.constant 1 : i32
    %0 = arith.muli %arg0, %c1_i32 : i32
    %1 = arith.addi %0, %arg1 : i32
    %c0_i32 = arith.constant 0 : i32
    %c0_i32_0 = arith.constant 0 : i32
    %c0_i32_1 = arith.constant 0 : i32
    return %1, %c0_i32, %c0_i32_0 : i32, i32, i32
  }
}

</mosaic_0001>

<bundles_post_ra>
// kernel: tpu_custom_call.1
= control target key start
LH: loop header
LB: loop body
LE: loop exit
PB: predicated region body
PF: predicated region fallthrough
CT: control target
= control target key end

     0   :  { %s1743_s27 = smov [#allocation3]   ;;  %s1744_s28 = smov [#allocation4]   ;;  %s2540_s0 = inlined_call_operand.hbm [shape: s32[6], index: 0, kind: input, shape index: {}]   ;;  %s2541_s3 = inlined_call_operand.hbm [shape: f32[6,25,2,128], index: 3, kind: input, shape index: {}]   ;;  %s2542_s4 = inlined_call_operand.hbm [shape: f32[6,25,2,128], index: 4, kind: input, shape index: {}]   ;;  %s2543_s5 = inlined_call_operand.hbm [shape: f32[6,8,2,128], index: 5, kind: input, shape index: {}]   ;;  %s2544_s6 = inlined_call_operand.hbm [shape: f32[6,1,128], index: 6, kind: output, shape index: {}]   ;;  %s2545_s1 = inlined_call_operand.hbm [shape: s32[6], index: 1, kind: input, shape index: {}]   ;;  %s2546_s2 = inlined_call_operand.vmem [shape: s32[6], index: 2, kind: input, shape index: {}]  }
   0x1   :  { %2557 = sst [smem:[#allocation36_spill]] %s2541_s3  ;;  %s12_s23 = sshll.u32 %s2540_s0, 4  ;;  %s13_s23 = int_to_ptr.hbm [resolvable:$true] %s12_s23 }
   0x2   :  { %2558 = sst [smem:[#allocation37_spill]] %s2542_s4  ;;  %s17_s26 = sshll.u32 %s2545_s1, 4  ;;  %s18_s26 = int_to_ptr.hbm [resolvable:$true] %s17_s26 }
   0x3   :  { %2559 = sst [smem:[#allocation38_spill]] %s2544_s6  ;;  %s22_s7 = sshll.u32 %s2546_s2, 4  ;;  %s23_s7 = int_to_ptr.vmem [resolvable:$true] %s22_s7 }
   0x4   :  { %15 = dma.hbm_to_smem %s13_s23, 16, %s1743_s27, [#allocation2] }
   0x5   :  { %20 = dma.hbm_to_smem %s18_s26, 16, %s1744_s28, [#allocation2] }
   0x6   :  { %s1745_s8 = smov [#allocation5]  }
   0x7   :  { %25 = dma.vmem_to_smem %s23_s7, 16, %s1745_s8, [#allocation2] }
   0x8   :  { %1677 = dma.done.wait [#allocation2], 48 }
   0x9   :  { %1678 = vsyncadd [#allocation2], 4294967248 }
   0xa   :  { %28 = sfence }
   0xb   :  { %29 = vsyncpa [#allocation7], 0 }
   0xc   :  { %31 = vsyncpa [#allocation7 + $0x1], 0 }
   0xd   :  { %32 = vsyncpa [#allocation10], 0 }
   0xe   :  { %34 = vsyncpa [#allocation10 + $0x1], 0 }
   0xf   :  { %35 = vsyncpa [#allocation8], 0 }
  0x10   :  { %37 = vsyncpa [#allocation8 + $0x1], 0  ;;  %s1793_s0 = smov 0   ;;  %s1795_s1 = smov 0  }
  0x11   :  { %s1797_s9 = smov 0   ;;  %s1799_s10 = smov 0  }
  0x12   :  { %s1801_s2 = smov 0   ;;  %s1803_s11 = smov 0  }
  0x13   :  { %s1805_s12 = smov 0   ;;  %s1807_s13 = smov 0  }
  0x14   :  { %s1809_s14 = smov 0   ;;  %s1811_s15 = smov 0  }
  0x15   :  { %s1813_s16 = smov 0   ;;  %s1815_s17 = smov 0  }
  0x16 LB: > { %2560 = sst [smem:[#allocation26_spill]] %s1705_s9  ;;  %s55_s18 = sadd.s32 1, %s1737_s16  ;;  %s1741_s17 = sphi %s1815_s17, %s43_s17   ;;  %s1737_s16 = sphi %s1813_s16, %s2605_s16   ;;  %s1733_s15 = sphi %s1811_s15, %s2604_s15   ;;  %s1729_s14 = sphi %s1809_s14, %s2603_s14   ;;  %s1725_s13 = sphi %s1807_s13, %s2611_s13   ;;  %s1721_s12 = sphi %s1805_s12, %s2610_s12   ;;  %s1717_s11 = sphi %s1803_s11, %s2601_s11   ;;  %s1713_s2 = sphi %s1801_s2, %s2609_s2   ;;  %s1709_s10 = sphi %s1799_s10, %s2608_s10   ;;  %s1705_s9 = sphi %s1797_s9, %s2599_s9   ;;  %s1701_s1 = sphi %s1795_s1, %s2607_s1   ;;  %s1697_s0 = sphi %s1793_s0, %s2606_s0  }
  0x17   : > { %2561 = sst [smem:[#allocation27_spill]] %s1717_s11  ;;  %p72_p0 = scmp.eq.s32.totalorder %s1741_s17, 0 }
  0x18   : > { %2562 = sst [smem:[#allocation28_spill]] %s1729_s14  ;;  %p57_p1 = scmp.ge.s32.totalorder %s55_s18, 6 }
  0x19   : > { %2563 = sst [smem:[#allocation29_spill]] %s1733_s15  ;;  %s98_s21 = sadd.s32 1, %s1717_s11 }
  0x1a   : > { %2564 = sst [smem:[#allocation30_spill]] %s1737_s16  ;;  %s2613_s18 = smov (%p57_p1, %s55_s18), 0 }
  0x1b   : > { %s88_s19 = sld [smem:[#allocation4 + %s1737_s16]]  ;;  %p105_p2 = scmp.ne.s32.totalorder %s1717_s11, %s1713_s2 }
  0x1c   : > { %s89_s20 = sld [smem:[#allocation5 + %s1737_s16]]  ;;  %p111_p3 = scmp.ne.s32.totalorder %s1713_s2, %s1709_s10 }
  0x1d   : > { %2565 = sst [smem:[#allocation31_spill]] %s2613_s18  ;;  %p1868_p4 = por %p105_p2, %p72_p0 }
  0x1e   : > { %s91_s22 = sld [smem:[#allocation4 + %s2613_s18]]  ;;  %p1253_p5 = scmp.lt.s32.totalorder %s1741_s17, 6 }
  0x1f   : > { %s92_s23 = sld [smem:[#allocation5 + %s2613_s18]]  ;;  %s221_s26 = sand.u32 1, %s1717_s11  }
  0x20   : > { %s1212_s27 = smul.u32 50, %s221_s26  ;;  %p1879_p6 = pnand %p1253_p5, %p1868_p4 }
  0x21   : > { %s1216_s29 = scalar_select %p1868_p4, [#allocation4], [#allocation13] }
  0x22   : > { %s223_s8 = scalar_lea.vmem [#allocation9], %s1212_s27  ;;  %p1168_p8 = scmp.ge.s32.totalorder %s1741_s17, 1 }
  0x23   : > { %s1885_s6 = sshll.u32 %s223_s8, 4  ;;  %s2615_s29 = smov (!%p1253_p5, %s1216_s29), [#allocation17] }
  0x24   : > { %s93_s30 = ssub.s32 %s88_s19, %s91_s22  ;;  %2568 = sst [smem:[#allocation32_spill]] %s1885_s6 }
  0x25   : > { %s94_s7 = ssub.s32 %s89_s20, %s92_s23  ;;  %p269_p9 = scmp.lt.s32.totalorder %s1741_s17, 7 }
  0x26   : > { %s95_s25 = sor.u32 %s94_s7, %s93_s30  ;;  %s1909_s27 = sadd.s32 4294967295, %s1741_s17  }
  0x27   : > { %p96_p7 = scmp.eq.s32.totalorder %s95_s25, 0  ;;  %p1904_p10 = pnand %p1168_p8, %p269_p9 }
  0x28   : > { %s1217_s26 = scalar_select %p1868_p4, %s1737_s16, 0 }
  0x29   : > { %s1892_s15 = scalar_select %p96_p7, %s1717_s11, %s98_s21  }
  0x2a   : > { %s2617_s26 = smov (!%p1253_p5, %s1217_s26), 0  ;;  %s1159_s24 = sadd.s32 4294967294, %s1741_s17  }
  0x2b   : > { %2569 = sst [smem:[#allocation33_spill]] %s1892_s15  ;;  %s59_s6 = ssub.s32 %s1737_s16, %s2613_s18 }
  0x2c   : > { %s1218_s19 = scalar_select %p1868_p4, [#allocation5], [#allocation14] }
  0x2d   : > { %s225_s20 = sld [smem:[%s2615_s29 + %s2617_s26]]  ;;  %p1917_p11 = scmp.eq.s32.totalorder %s59_s6, 0 }
  0x2e   : > { %s2619_s19 = smov (!%p1253_p5, %s1218_s19), [#allocation18]  ;;  %s2571_s4 = sld [smem:[#allocation37_spill]] }
  0x2f   : > { %s226_s22 = sld [smem:[%s2619_s19 + %s2617_s26]]  ;;  %s64_s19 = sadd.s32 1, %s1729_s14 }
  0x30   : > { %s2573_s11 = sand.u32 1, %s1741_s17   ;;  %p1515_p13 = pneg %p1879_p6 }
  0x33   : > { %s1213_s21 = smul.u32 25, %s225_s20  ;;  %s1924_s20 = scalar_lea.sflag [#allocation10], %s2573_s11 }
  0x34   : > { %s1518_s6 = scalar_lea.hbm %s2571_s4, 300 }
  0x35   : > { %s230_s25 = sadd.s32 %s1213_s21, %s226_s22 }
  0x36   : > { %s1164_s30 = sshll.u32 %s230_s25, 1 }
  0x37   : > { %s232_s8 = scalar_lea.hbm %s2571_s4, %s1164_s30 }
  0x38   : > { %s233_s15 = sshll.u32 %s232_s8, 4  ;;  %s234_s15 = int_to_ptr.hbm [resolvable:$true] %s233_s15 }
  0x39   : > { %s1511_s22 = sshra.s32 %s234_s15, 4  ;;  %s1512_s22 = int_to_ptr.hbm [resolvable:$true] %s1511_s22 }
  0x3a   : > { %s1513_s21 = scalar_lea.hbm %s1512_s22, 50  ;;  %p1519_p4 = scmp.lt.s32.totalorder %s1512_s22, %s2571_s4 }
  0x3b   : > { %p1514_p12 = scmp.ne.s32.totalorder %s1512_s22, %s1513_s21  ;;  %p1520_p7 = scmp.lt.s32.totalorder %s1518_s6, %s1513_s21 }
  0x3d   : > { %p1516_p1 = pnand %p1515_p13, %p1514_p12  ;;  %p1521_p8 = por %p1520_p7, %p1519_p4 }
  0x3f   : > { %p1517_p2 = pneg %p1516_p1 }
  0x41   : > { %p1522_p9 = pnand %p1521_p8, %p1517_p2 }
  0x43   : > { %1525 = shalt.err (!%p1522_p9)
}
  0x44   : > { %s2550_s11 = smov 32   ;;  %s2574_s8 = sld [smem:[#allocation32_spill]] }
  0x45   : > { %s2551_s22 = smov 2   ;;  %p71_p12 = scmp.ne.s32.totalorder %s1729_s14, %s1725_s13 }
  0x46   : > { %s1945_s25 = scalar_select %p1917_p11, %s1729_s14, %s64_s19  }
  0x47   : > { %p77_p13 = scmp.ne.s32.totalorder %s1725_s13, %s1721_s12  ;;  %p78_p1 = scmp.eq.s32.totalorder %s1909_s27, 0 }
  0x48   : > { %2576 = sst [smem:[#allocation34_spill]] %s1945_s25  ;;  %p171_p2 = scmp.eq.s32.totalorder %s1909_s27, 5 }
  0x49   : > { %p1955_p4 = por %p72_p0, %p71_p12  ;;  %p177_p7 = scmp.eq.s32.totalorder %s1159_s24, 5 }
  0x4a   : > { %s2575_s21 = int_to_ptr.vmem [resolvable:$true] %s2574_s8  ;;  %p1961_p8 = por %p78_p1, %p77_p13 }
  0x4b   : > { %1241 = dma.hbm_to_vmem [thread:$0]  (!%p1879_p6), %s234_s15, 800, %s2575_s21, %s1924_s20, %s2550_s11, %s2550_s11, %s2551_s22  }
  0x4c   : > { %p1970_p6 = por %p111_p3, %p78_p1  ;;  %p1974_p11 = por %p171_p2, %p71_p12 }
  0x4d   : > { %p1978_p9 = por %p177_p7, %p77_p13  ;;  %s197_s24 = sand.u32 1, %s1729_s14  }
  0x4e   : > { %s1163_s6 = smul.u32 50, %s1737_s16  ;;  %s1162_s10 = sshll.u32 %s197_s24, 1 }
  0x4f   : > { %s2581_s19 = scalar_select %p1978_p9, 1, 0 }
  0x50   : > { %s2583_s3 = sld [smem:[#allocation36_spill]]  ;;  %s201_s11 = scalar_lea.vmem [#allocation6], %s1162_s10 }
  0x51   : > { %2582 = sst [smem:[#allocation32_spill]] %s2581_s19  ;;  %s212_s22 = sshll.u32 %s201_s11, 4  ;;  %s213_s22 = int_to_ptr.vmem [resolvable:$true] %s212_s22 }
  0x52   : > { %p1232_p3 = pnand %p1253_p5, %p1955_p4  ;;  %s198_s25 = scalar_lea.sflag [#allocation7], %s197_s24 }
  0x53   : > { %s122_s7 = sld [smem:[#allocation4 + %s1737_s16]]  ;;  %p139_p12 = scmp.ne.s32.totalorder %s1705_s9, %s1701_s1 }
  0x54   : > { %s123_s29 = sld [smem:[#allocation5 + %s1737_s16]]  ;;  %p145_p13 = scmp.ne.s32.totalorder %s1701_s1, %s1697_s0 }
  0x55   : > { %s126_s10 = sld [smem:[#allocation5 + %s2613_s18]]  ;;  %p2001_p2 = por %p139_p12, %p72_p0 }
  0x56   : > { %s1066_s8 = scalar_lea.hbm %s2583_s3, %s1163_s6  ;;  %s125_s6 = sld [smem:[#allocation4 + %s2613_s18]] }
  0x57   : > { %s1067_s21 = scalar_lea.hbm %s1066_s8, 8  ;;  %p2007_p4 = por %p145_p13, %p78_p1 }
  0x58   : > { %s210_s4 = sshll.u32 %s1067_s21, 4  ;;  %p2015_p7 = pnand %p1253_p5, %p2001_p2  ;;  %s211_s4 = int_to_ptr.hbm [resolvable:$true] %s210_s4 }
  0x59   : > { %1234 = dma.hbm_to_vmem [thread:$0]  (!%p1232_p3), %s211_s4, 32, %s213_s22, %s198_s25  }
  0x5a   : > { %s1221_s0 = scalar_select %p2001_p2, [#allocation4], [#allocation15] }
  0x5b   : > { %s128_s30 = ssub.s32 %s123_s29, %s126_s10  ;;  %s132_s24 = sadd.s32 1, %s1705_s9 }
  0x5c   : > { %s127_s25 = ssub.s32 %s122_s7, %s125_s6  ;;  %s247_s21 = sand.u32 1, %s1705_s9  }
  0x5d   : > { %s129_s8 = sor.u32 %s128_s30, %s127_s25  ;;  %s2621_s0 = smov (!%p1253_p5, %s1221_s0), [#allocation19] }
  0x5e   : > { %p130_p0 = scmp.eq.s32.totalorder %s129_s8, 0  ;;  %s1165_s7 = sshll.u32 %s247_s21, 4 }
  0x5f   : > { %s1222_s3 = scalar_select %p2001_p2, %s1737_s16, 0 }
  0x60   : > { %s2027_s18 = scalar_select %p130_p0, %s1705_s9, %s132_s24  }
  0x61   : > { %s2623_s3 = smov (!%p1253_p5, %s1222_s3), 0  ;;  %s249_s10 = scalar_lea.vmem [#allocation11], %s1165_s7 }
  0x62   : > { %2587 = sst [smem:[#allocation35_spill]] %s2027_s18  ;;  %s261_s25 = sshll.u32 %s249_s10, 4  ;;  %s262_s25 = int_to_ptr.vmem [resolvable:$true] %s261_s25 }
  0x63   : > { %s1223_s14 = scalar_select %p2001_p2, [#allocation5], [#allocation16] }
  0x64   : > { %s251_s19 = sld [smem:[%s2621_s0 + %s2623_s3]] }
  0x65   : > { %s2625_s14 = smov (!%p1253_p5, %s1223_s14), [#allocation20]  ;;  %p1575_p5 = pneg %p2015_p7 }
  0x66   : > { %s252_s29 = sld [smem:[%s2625_s14 + %s2623_s3]] }
  0x6a   : > { %s1166_s6 = sshll.u32 %s251_s19, 3  ;;  %s1578_s19 = scalar_lea.hbm %s2543_s5, 96 }
  0x6c   : > { %s256_s30 = sadd.s32 %s1166_s6, %s252_s29 }
  0x6d   : > { %s1167_s8 = sshll.u32 %s256_s30, 1 }
  0x6e   : > { %s258_s18 = scalar_lea.hbm %s2543_s5, %s1167_s8 }
  0x6f   : > { %s259_s9 = sshll.u32 %s258_s18, 4  ;;  %s260_s9 = int_to_ptr.hbm [resolvable:$true] %s259_s9 }
  0x70   : > { %s1571_s11 = sshra.s32 %s260_s9, 4  ;;  %s1572_s11 = int_to_ptr.hbm [resolvable:$true] %s1571_s11 }
  0x71   : > { %s1573_s0 = scalar_lea.hbm %s1572_s11, 16  ;;  %p1579_p13 = scmp.lt.s32.totalorder %s1572_s11, %s2543_s5 }
  0x72   : > { %p1574_p1 = scmp.ne.s32.totalorder %s1572_s11, %s1573_s0  ;;  %p1580_p2 = scmp.lt.s32.totalorder %s1578_s19, %s1573_s0 }
  0x74   : > { %p1576_p3 = pnand %p1575_p5, %p1574_p1  ;;  %p1581_p0 = por %p1580_p2, %p1579_p13 }
  0x76   : > { %p1577_p12 = pneg %p1576_p3 }
  0x78   : > { %p1582_p9 = pnand %p1581_p0, %p1577_p12 }
  0x7a   : > { %1585 = shalt.err (!%p1582_p9)
}
  0x7b   : > { %s2588_s16 = smov 2   ;;  %s2589_s18 = smov 32  }
  0x7c   : > { %1248 = dma.hbm_to_vmem [thread:$0]  (!%p2015_p7), %s260_s9, 256, %s262_s25, %s1924_s20, %s2589_s18, %s2589_s18, %s2588_s16  }
  0x7d   : > { %273 = sbr.rel (%p1904_p10) target bundleno = 634 (0x27a), region = 32  ;;  %s2057_s29 = sand.u32 (!%p1904_p10), 1, %s1725_s13  }
  0x7e   : > { %s1169_s6 = sshll.u32 (!%p1904_p10), %s2057_s29, 1  ;;  %s276_s10 = scalar_lea.sflag (!%p1904_p10), [#allocation7], %s2057_s29 }
  0x7f   : > { %s279_s30 = scalar_lea.vmem (!%p1904_p10), [#allocation6], %s1169_s6 }
  0x82   : > { %1680 = dma.done.wait (%p1961_p8), %s276_s10, 32  }
  0x83   : > { %1682 = vsyncadd (%p1961_p8), %s276_s10, 4294967264  ;;  %s285_s9 = sand.u32 1, %s1909_s27   ;;  %s287_s23 = sand.u32 1, %s1713_s2  }
  0x84   : > { %s1214_s20 = smul.u32 50, %s287_s23  ;;  %s286_s22 = scalar_lea.sflag [#allocation10], %s285_s9 }
  0x86   : > { %s2067_s25 = scalar_lea.vmem [#allocation9], %s1214_s20 }
  0x87   : > { %1684 = dma.done.wait (%p1970_p6), %s286_s22, 800  }
  0x88   : > { %1686 = vsyncadd (%p1970_p6), %s286_s22, 4294966496  ;;  %s297_s8 = sand.u32 1, %s1701_s1  }
  0x89   : > { %s1170_s24 = sshll.u32 %s297_s8, 4 }
  0x8a   : > { %s2074_s28 = scalar_lea.vmem [#allocation11], %s1170_s24 }
  0x8b   : > { %1688 = dma.done.wait (%p2007_p4), %s286_s22, 256  }
  0x8c   : > { %1690 = vsyncadd (%p2007_p4), %s286_s22, 4294967040  ;;  %s2590_s27 = sld [smem:[#allocation29_spill]]  ;;  %v341_v0 = vlaneseq  ;;  %v2085_v2 = vld [vmem:[%s279_s30] sm:$0x3]  ;;  %s2088_s15 = scalar_lea.vmem [#allocation12], %s2057_s29 }
  0x8e   : > { %v2083_v1 = vand.u32 127, %v341_v0 }
  0x92   : > { %s2081_s11 = sld [smem:[#allocation3 + %s2590_s27]] }
  0x98   : > { %p1171_p10 = scmp.ne.s32.totalorder %s2081_s11, 0 }
  0x9a   : > { %347 = sbr.rel (%p1171_p10) target bundleno = 317 (0x13d), region = 48 }
  0x9f   : > { %v351_v3 = vand.u32 2147483647, %v2085_v2  ;;  %v348_v8 = vmax.f32 %v2085_v2, 0.0  ;;  %v349_v9 = vmul.f32 0.0, %v2085_v2  ;;  %vm359_vm0 = vcmask 1041408  }
  0xa0   : > { %vm370_vm1 = vcmp.eq.s32.totalorder %v2083_v1, 2 }
  0xa1   : > { %v352_v4 = vsub.f32 0.0, %v351_v3  ;;  %v350_v10 = vsub.f32 %v348_v8, %v349_v9 }
  0xa3   : > { %v353_v5 = vmul.f32 1.442695, %v352_v4 }
  0xa5   : > { %1357 = vpow2.f32 %v353_v5 }
  0xab   : > { %v1358_v6 = vpop.eup %1357 }
  0xac   : > { %v355_v7 = vadd.f32 1.0, %v1358_v6 }
  0xae   : > { %1359 = vlog2.f32 %v355_v7 }
  0xb4   : > { %v1360_v11 = vpop.eup %1359 }
  0xb5   : > { %v357_v12 = vmul.f32 0.6931472, %v1360_v11 }
  0xb7   : > { %v358_v13 = vadd.f32 %v357_v12, %v350_v10 }
  0xb9   : > { %v360_v14 = vsel %vm359_vm0, %v358_v13, 0.0 }
  0xba   : > { %361 = vadd.xlane.f32.xlu0 %v360_v14 }
 0x12d   : > { %v362_v15 = vpop.xlane.xlu0 %361 }
 0x12e   : > { %v363_v16 = vsel %vm359_vm0, %v362_v15, 0.0 }
 0x12f   : > { %v364_v17 = vrot.slane %v363_v16, 4 }
 0x131   : > { %v365_v18 = vadd.f32 %v364_v17, %v363_v16 }
 0x133   : > { %v366_v19 = vrot.slane %v365_v18, 2 }
 0x135   : > { %v367_v20 = vadd.f32 %v366_v19, %v365_v18 }
 0x137   : > { %v368_v21 = vrot.slane %v367_v20, 1 }
 0x139   : > { %v369_v22 = vadd.f32 %v368_v21, %v367_v20 }
 0x13b   : > { %v371_v23 = vsel %vm370_vm1, %v369_v22, 0.0 }
 0x13c   : > { %372 = vst [vmem:[%s2088_s15] sm:$0x1] %v371_v23 }
 0x13d PF: > { %p1172_p8 = scmp.eq.s32.totalorder %s2081_s11, 0 }
 0x13f   : > { %376 = sbr.rel (%p1172_p8) target bundleno = 613 (0x265), region = 52 }
 0x144   : > { %v377_v24 = vld [vmem:[%s2067_s25] sm:$0x3]  ;;  %v1173_v25 = vld [vmem:[%s2067_s25 + $0x2] sm:$0x3]  ;;  %v1175_v27 = vld [vmem:[%s2067_s25 + $0x6] sm:$0x3] }
 0x145   : > { %v2100_v26 = vld [vmem:[%s2074_s28] sm:$0x3]  ;;  %v1180_v28 = vld [vmem:[%s2074_s28 + $0xa] sm:$0x3]  ;;  %v400_v29 = vshrl.u32 %v341_v0, 7  ;;  %vm592_vm15 = vcmask 1041408  }
 0x146   : > { %vm465_vm2 = vcmp.gt.f32.partialorder %v2100_v26, 0.0  ;;  %v1183_v30 = vmul.f32 -1.442695, %v377_v24  ;;  %v1185_v31 = vmul.f32 -1.442695, %v1173_v25  ;;  %vm1009_vm0 = vcmp.eq.s32.totalorder %v2083_v1, 1 }
 0x147   : > { %v404_v32 = vmul.u32 128, %v400_v29  ;;  %v461_v33 = vmul.f32 1.442695, %v1175_v27  ;;  %v2107_v34 = vsel %vm465_vm2, %v1180_v28, 1.0  ;;  %v1174_v35 = vld [vmem:[%s2067_s25 + $0x4] sm:$0x3] }
 0x148   : > { %1361 = vpow2.f32 %v1183_v30  ;;  %v522_v36 = vadd.f32 1e-07, %v2107_v34  ;;  %v2112_v37 = vld [vmem:[%s2074_s28 + $0x2] sm:$0x3]  ;;  %v457_v40 = vmul.f32 1.442695, %v1174_v35 }
 0x149   : > { %1363 = vpow2.f32 %v1185_v31  ;;  %v636_v38 = vmul.f32 0.5, %v2112_v37  ;;  %v2116_v39 = vadd.s32 %v404_v32, %v2083_v1  ;;  %v1179_v45 = vld [vmem:[%s2074_s28 + $0x8] sm:$0x3]  ;;  %v1182_v50 = vld [vmem:[%s2074_s28 + $0xe] sm:$0x3]  ;;  %vm1007_vm1 = vcmp.eq.s32.totalorder %v2083_v1, 0 }
 0x14a   : > { %1365 = vpow2.f32 %v461_v33  ;;  %v2128_v53 = vsel %vm465_vm2, %v1179_v45, 1.0  ;;  %v1181_v57 = vld [vmem:[%s2074_s28 + $0xc] sm:$0x3] }
 0x14b   : > { %1367 = vrcp.f32 %v522_v36  ;;  %v2118_v41 = vfloor.f32 %v636_v38  ;;  %v406_v46 = vcvt.s32.f32 %v2116_v39  ;;  %v2178_v39 = vld [vmem:[%s2067_s25 + $0xa] sm:$0x3] }
 0x14c   : > { %1369 = vpow2.f32 %v457_v40 }
 0x14d   : > { %v654_v43 = vmul.f32 0.5, %v2118_v41  ;;  %v2132_v54 = vmul.f32 0.0625, %v406_v46 }
 0x14e   : > { %v1362_v42 = vpop.eup %1361 }
 0x14f   : > { %v1364_v44 = vpop.eup %1363  ;;  %v414_v47 = vadd.f32 1.0, %v1362_v42  ;;  %v2124_v51 = vfloor.f32 %v654_v43  ;;  %v408_v62 = vfloor.f32 %v2132_v54 }
 0x150   : > { %v437_v48 = vadd.f32 1.0, %v1364_v44  ;;  %v1366_v49 = vpop.eup %1365 }
 0x151   : > { %1371 = vrcp.f32 %v414_v47  ;;  %v1368_v52 = vpop.eup %1367  ;;  %v463_v55 = vmul.f32 %v1366_v49, %v1182_v50  ;;  %v672_v59 = vmul.f32 0.5, %v2124_v51  ;;  %vm420_vm3 = vweird.f32 %v414_v47 }
 0x152   : > { %1373 = vrcp.f32 %v437_v48  ;;  %v1370_v56 = vpop.eup %1369  ;;  %v2136_v58 = vmul.f32 %v1368_v52, %v2128_v53  ;;  %v424_v4 = vand.u32 2147483647, %v414_v47  ;;  %v426_v7 = vand.u32 2147483648, %v414_v47 }
 0x153   : > { %v464_v60 = vmul.f32 0.001953125, %v463_v55  ;;  %v2141_v63 = vfloor.f32 %v672_v59  ;;  %v459_v5 = vmul.f32 %v1370_v56, %v1181_v57  ;;  %vm443_vm4 = vweird.f32 %v437_v48  ;;  %v2183_v56 = vld [vmem:[%s2067_s25 + $0xc] sm:$0x3]  ;;  %v1177_v59 = vld [vmem:[%s2074_s28 + $0x4] sm:$0x3] }
 0x154   : > { %1375 = vrcp.f32 %v2136_v58  ;;  %v449_v9 = vand.u32 2147483648, %v437_v48  ;;  %v447_v14 = vand.u32 2147483647, %v437_v48  ;;  %vm525_vm7 = vcmp.gt.f32.partialorder %v2136_v58, 1.0 }
 0x155   : > { %v469_v6 = vsel %vm465_vm2, %v464_v60, 1.0  ;;  %v690_v12 = vmul.f32 0.5, %v2141_v63  ;;  %v460_v16 = vmul.f32 0.001953125, %v459_v5  ;;  %v409_v19 = vmul.f32 16.0, %v408_v62 }
 0x156   : > { %v550_v11 = vadd.f32 1e-07, %v469_v6  ;;  %v427_v20 = vor.u32 1.1754944e-38, %v426_v7  ;;  %vm425_vm9 = vcmp.eq.f32.partialorder %v424_v4, 8.507059e+37  ;;  %v450_v24 = vor.u32 1.1754944e-38, %v449_v9 }
 0x157   : > { %v1372_v61 = vpop.eup %1371  ;;  %v2147_v17 = vfloor.f32 %v690_v12  ;;  %vm448_vm11 = vcmp.eq.f32.partialorder %v447_v14, 8.507059e+37  ;;  %v468_v30 = vsel %vm465_vm2, %v460_v16, 1.0  ;;  %v410_v36 = vsub.f32 %v406_v46, %v409_v19 }
 0x158   : > { %v1374_v0 = vpop.eup %1373  ;;  %v416_v3 = vmul.f32 %v1372_v61, %v414_v47  ;;  %vm421_vm5 = vweird.f32 %v1372_v61  ;;  %1377 = vrcp.f32 %v550_v11  ;;  %v480_v49 = vmul.f32 0.5, %v2128_v53 }
 0x159   : > { %v439_v8 = vmul.f32 %v1374_v0, %v437_v48  ;;  %vm444_vm6 = vweird.f32 %v1374_v0  ;;  %vm422_vm8 = vmor %vm420_vm3, %vm421_vm5  ;;  %v708_v31 = vmul.f32 0.5, %v2147_v17  ;;  %v474_v50 = vmul.f32 0.5, %v468_v30 }
 0x15a   : > { %v417_v10 = vsub.f32 1.0, %v416_v3  ;;  %v1376_v18 = vpop.eup %1375  ;;  %vm2153_vm10 = vmor %vm443_vm4, %vm444_vm6  ;;  %v483_v52 = vmul.f32 0.5, %v2107_v34  ;;  %v645_v55 = vand.u32 2147483647, %v2178_v39  ;;  %v1178_v3 = vld [vmem:[%s2074_s28 + $0x6] sm:$0x3]  ;;  %v495_v5 = vmul.f32 %v469_v6, %v468_v30 }
 0x15b   : > { %v440_v13 = vsub.f32 1.0, %v439_v8  ;;  %v2160_v25 = vsel %vm525_vm7, %v1376_v18, %v2136_v58  ;;  %v2173_v47 = vfloor.f32 %v708_v31  ;;  %v663_v11 = vand.u32 2147483647, %v2183_v56 }
 0x15c   : > { %v418_v15 = vmul.f32 %v1372_v61, %v417_v10  ;;  %v530_v28 = vadd.f32 1.0, %v2160_v25  ;;  %v1188_v45 = vadd.f32 -1.0, %v2160_v25  ;;  %vm528_vm12 = vcmp.gt.f32.partialorder %v2160_v25, 0.41421357 }
 0x15d   : > { %v441_v21 = vmul.f32 %v1374_v0, %v440_v13  ;;  %v726_v8 = vmul.f32 0.5, %v2173_v47  ;;  %v646_v10 = vsub.f32 0.0, %v645_v55  ;;  %vm1015_vm3 = vcmp.eq.s32.totalorder %v2083_v1, 3 }
 0x15e   : > { %v419_v22 = vadd.f32 %v1372_v61, %v418_v15  ;;  %1379 = vrcp.f32 %v530_v28  ;;  %v1378_v35 = vpop.eup %1377 }
 0x15f   : > { %v442_v27 = vadd.f32 %v1374_v0, %v441_v21  ;;  %v2170_v43 = vmul.f32 %v1378_v35, %v468_v30 }
 0x160   : > { %v423_v29 = vsel %vm422_vm8, %v1372_v61, %v419_v22  ;;  %v477_v61 = vmul.f32 0.5, %v469_v6 }
 0x161   : > { %v428_v32 = vsel %vm425_vm9, %v427_v20, %v423_v29  ;;  %v446_v33 = vsel %vm2153_vm10, %v1374_v0, %v442_v27  ;;  %1381 = vrcp.f32 %v2170_v43  ;;  %v496_v0 = vmul.f32 %v2107_v34, %v2128_v53 }
 0x162   : > { %v430_v38 = vmul.f32 2.0, %v428_v32  ;;  %v451_v40 = vsel %vm448_vm11, %v450_v24, %v446_v33  ;;  %vm553_vm13 = vcmp.gt.f32.partialorder %v2170_v43, 1.0  ;;  %v664_v24 = vsub.f32 0.0, %v663_v11 }
 0x163   : > { %v453_v42 = vmul.f32 2.0, %v451_v40 }
 0x164   : > { %v1184_v44 = vadd.f32 -0.5, %v430_v38  ;;  %v1380_v57 = vpop.eup %1379  ;;  %v665_v11 = vmul.f32 1.442695, %v664_v24 }
 0x165   : > { %v1186_v48 = vadd.f32 -0.5, %v453_v42  ;;  %v532_v7 = vmul.f32 %v1380_v57, %v1188_v45  ;;  %v647_v42 = vmul.f32 1.442695, %v646_v10  ;;  %v2215_v57 = vld [vmem:[%s2067_s25 + $0xe] sm:$0x3] }
 0x166   : > { %v432_v46 = vadd.f32 %v1184_v44, %v410_v36 }
 0x167   : > { %v455_v60 = vadd.f32 %v1186_v48, %v408_v62  ;;  %v2200_v34 = vsel %vm528_vm12, %v532_v7, %v2160_v25  ;;  %v1382_v53 = vpop.eup %1381  ;;  %1383 = vpow2.f32 %v647_v42 }
 0x168   : > { %v433_v4 = vmul.f32 0.0625, %v432_v46  ;;  %v2206_v20 = vmul.f32 %v2200_v34, %v2200_v34  ;;  %v2211_v23 = vsel %vm553_vm13, %v1382_v53, %v2170_v43  ;;  %v656_v53 = vmul.f32 2.0, %v2124_v51 }
 0x169   : > { %v456_v9 = vmul.f32 0.0625, %v455_v60  ;;  %v558_v7 = vadd.f32 1.0, %v2211_v23  ;;  %vm556_vm14 = vcmp.gt.f32.partialorder %v2211_v23, 0.41421357 }
 0x16a   : > { %v470_v54 = vsel %vm465_vm2, %v1177_v59, %v433_v4  ;;  %v475_v62 = vsub.f32 %v433_v4, %v474_v50  ;;  %v476_v12 = vadd.f32 %v474_v50, %v433_v4  ;;  %v535_v40 = vmul.f32 -0.09090909, %v2206_v20 }
 0x16b   : > { %v471_v6 = vsel %vm465_vm2, %v1178_v3, %v456_v9  ;;  %v478_v13 = vsub.f32 %v456_v9, %v477_v61  ;;  %v479_v14 = vadd.f32 %v477_v61, %v456_v9  ;;  %v481_v15 = vsub.f32 %v470_v54, %v480_v49 }
 0x16c   : > { %v482_v16 = vadd.f32 %v480_v49, %v470_v54  ;;  %v484_v18 = vsub.f32 %v471_v6, %v483_v52  ;;  %v485_v19 = vadd.f32 %v483_v52, %v471_v6  ;;  %v497_v52 = vadd.f32 %v496_v0, %v495_v5 }
 0x16d   : > { %v487_v21 = vmax.f32 %v475_v62, %v481_v15  ;;  %v503_v22 = vmin.f32 %v475_v62, %v481_v15  ;;  %v536_v55 = vadd.f32 0.11111111, %v535_v40  ;;  %v2217_v61 = vfloor.f32 %v726_v8 }
 0x16e   : > { %v486_v27 = vmin.f32 %v476_v12, %v482_v16  ;;  %v490_v28 = vmin.f32 %v479_v14, %v485_v19  ;;  %v491_v29 = vmax.f32 %v478_v13, %v484_v18  ;;  %v502_v30 = vmax.f32 %v476_v12, %v482_v16 }
 0x16f   : > { %v505_v31 = vmax.f32 %v479_v14, %v485_v19  ;;  %v506_v32 = vmin.f32 %v478_v13, %v484_v18  ;;  %v512_v33 = vadd.f32 %v482_v16, %v481_v15  ;;  %v516_v35 = vadd.f32 %v485_v19, %v484_v18  ;;  %v2234_v18 = vld [vmem:[%s2067_s25 + $0x10] sm:$0x3] }
 0x170   : > { %v488_v36 = vsub.f32 %v486_v27, %v487_v21  ;;  %v492_v38 = vsub.f32 %v490_v28, %v491_v29  ;;  %v504_v44 = vsub.f32 %v502_v30, %v503_v22  ;;  %v537_v4 = vmul.f32 %v536_v55, %v2206_v20  ;;  %v1384_v27 = vpop.eup %1383 }
 0x171   : > { %v507_v45 = vsub.f32 %v505_v31, %v506_v32  ;;  %v513_v48 = vsub.f32 %v512_v33, %v475_v62  ;;  %v517_v49 = vsub.f32 %v516_v35, %v478_v13  ;;  %v681_v0 = vand.u32 2147483647, %v2215_v57 }
 0x172   : > { %v489_v46 = vmax.f32 %v488_v36, 0.0  ;;  %v493_v50 = vmax.f32 %v492_v38, 0.0  ;;  %v508_v9 = vmul.f32 %v504_v44, %v504_v44  ;;  %v538_v54 = vadd.f32 -0.14285715, %v537_v4 }
 0x173   : > { %v514_v59 = vsub.f32 %v513_v48, %v476_v12  ;;  %v518_v60 = vsub.f32 %v517_v49, %v479_v14  ;;  %v509_v10 = vmul.f32 %v507_v45, %v507_v45  ;;  %1385 = vrcp.f32 %v558_v7 }
 0x174   : > { %v2219_v3 = vmul.f32 %v493_v50, %v489_v46  ;;  %v638_v8 = vmul.f32 2.0, %v2118_v41  ;;  %1387 = vpow2.f32 %v665_v11  ;;  %v1748_v6 = vmov 0.0  }
 0x175   : > { %v515_v62 = vmul.f32 %v514_v59, %v514_v59  ;;  %v519_v12 = vmul.f32 %v518_v60, %v518_v60  ;;  %v2229_v13 = vsel %vm465_vm2, 1.0, %v1748_v6  ;;  %v539_v15 = vmul.f32 %v538_v54, %v2206_v20  ;;  %v2256_v59 = vld [vmem:[%s2067_s25 + $0x12] sm:$0x3] }
 0x176   : > { %v498_v5 = vsub.f32 %v497_v52, %v2219_v3  ;;  %v674_v16 = vmul.f32 2.0, %v2141_v63  ;;  %v1189_v19 = vadd.f32 -1.0, %v2211_v23  ;;  %v639_v21 = vsub.f32 %v2112_v37, %v638_v8 }
 0x177   : > { %v682_v22 = vsub.f32 0.0, %v681_v0  ;;  %v744_v24 = vmul.f32 0.5, %v2217_v61  ;;  %v510_v28 = vadd.f32 %v509_v10, %v508_v9  ;;  %v540_v29 = vadd.f32 0.2, %v539_v15 }
 0x178   : > { %v499_v14 = vadd.f32 1e-07, %v498_v5  ;;  %v657_v30 = vsub.f32 %v2118_v41, %v656_v53  ;;  %v520_v31 = vadd.f32 %v519_v12, %v515_v62  ;;  %v649_v32 = vadd.f32 1.0, %v1384_v27  ;;  %v2281_v27 = vld [vmem:[%s2067_s25 + $0x14] sm:$0x3] }
 0x179   : > { %v699_v33 = vand.u32 2147483647, %v2234_v18  ;;  %v1386_v35 = vpop.eup %1385  ;;  %v541_v36 = vmul.f32 %v540_v29, %v2206_v20  ;;  %v642_v37 = vmax.f32 %v2178_v39, 0.0  ;;  %v675_v38 = vsub.f32 %v2124_v51, %v674_v16 }
 0x17a   : > { %1389 = vrcp.f32 %v499_v14  ;;  %v683_v40 = vmul.f32 1.442695, %v682_v22  ;;  %v1388_v42 = vpop.eup %1387  ;;  %v560_v44 = vmul.f32 %v1386_v35, %v1189_v19  ;;  %v643_v45 = vmul.f32 %v2178_v39, %v639_v21 }
 0x17b   : > { %1391 = vlog2.f32 %v649_v32  ;;  %v660_v41 = vmax.f32 %v2183_v56, 0.0  ;;  %v542_v48 = vadd.f32 -0.33333334, %v541_v36  ;;  %v661_v49 = vmul.f32 %v2183_v56, %v657_v30 }
 0x17c   : > { %v667_v46 = vadd.f32 1.0, %v1388_v42  ;;  %1393 = vpow2.f32 %v683_v40  ;;  %v2251_v50 = vsel %vm556_vm14, %v560_v44, %v2211_v23  ;;  %v678_v51 = vmax.f32 %v2215_v57, 0.0 }
 0x17d   : > { %v692_v52 = vmul.f32 2.0, %v2147_v17  ;;  %v700_v55 = vsub.f32 0.0, %v699_v33  ;;  %v543_v39 = vmul.f32 %v542_v48, %v2206_v20  ;;  %v2261_v60 = vmul.f32 %v2251_v50, %v2251_v50  ;;  %v2295_v48 = vld [vmem:[%s2067_s25 + $0x16] sm:$0x3] }
 0x17e   : > { %1395 = vlog2.f32 %v667_v46  ;;  %v679_v56 = vmul.f32 %v2215_v57, %v675_v38  ;;  %v511_v7 = vadd.f32 1e-07, %v510_v28  ;;  %v710_v10 = vmul.f32 2.0, %v2173_v47 }
 0x17f   : > { %v701_v9 = vmul.f32 1.442695, %v700_v55  ;;  %v2265_v11 = vfloor.f32 %v744_v24  ;;  %v2267_v0 = vmul.f32 0.25, %v520_v31  ;;  %v544_v5 = vadd.f32 1.0, %v543_v39  ;;  %v2301_v39 = vld [vmem:[%s2067_s25 + $0x18] sm:$0x3] }
 0x180   : > { %v1390_v4 = vpop.eup %1389  ;;  %v563_v54 = vmul.f32 -0.09090909, %v2261_v60  ;;  %v717_v20 = vand.u32 2147483647, %v2256_v59  ;;  %v644_v62 = vsub.f32 %v642_v37, %v643_v45  ;;  %v662_v12 = vsub.f32 %v660_v41, %v661_v49 }
 0x181   : > { %v1392_v8 = vpop.eup %1391  ;;  %v693_v57 = vsub.f32 %v2141_v63, %v692_v52  ;;  %1397 = vpow2.f32 %v701_v9  ;;  %v545_v6 = vmul.f32 %v544_v5, %v2200_v34  ;;  %v2273_v15 = vsub.f32 %v678_v51, %v679_v56 }
 0x182   : > { %v1394_v53 = vpop.eup %1393  ;;  %v564_v14 = vadd.f32 0.11111111, %v563_v54  ;;  %v696_v16 = vmax.f32 %v2234_v18, 0.0  ;;  %v2277_v19 = vmul.f32 %v1390_v4, %v2219_v3  ;;  %v711_v22 = vsub.f32 %v2147_v17, %v710_v10 }
 0x183   : > { %v685_v21 = vadd.f32 1.0, %v1394_v53  ;;  %v718_v24 = vsub.f32 0.0, %v717_v20  ;;  %v546_v63 = vadd.f32 0.7853982, %v545_v6  ;;  %v618_v34 = vand.u32 2147483647, %v2085_v2 }
 0x184   : > { %v1396_v28 = vpop.eup %1395  ;;  %v565_v29 = vmul.f32 %v564_v14, %v2261_v60  ;;  %v728_v30 = vmul.f32 2.0, %v2217_v61  ;;  %v651_v31 = vmul.f32 0.6931472, %v1392_v8  ;;  %v697_v3 = vmul.f32 %v2234_v18, %v693_v57 }
 0x185   : > { %1399 = vlog2.f32 %v685_v21  ;;  %v719_v32 = vmul.f32 1.442695, %v718_v24  ;;  %v619_v35 = vsub.f32 0.0, %v618_v34  ;;  %v669_v17 = vmul.f32 0.6931472, %v1396_v28 }
 0x186   : > { %v566_v33 = vadd.f32 -0.14285715, %v565_v29  ;;  %v714_v36 = vmax.f32 %v2256_v59, 0.0  ;;  %v547_v38 = vsel %vm528_vm12, %v546_v63, %v545_v6  ;;  %v715_v40 = vmul.f32 %v2256_v59, %v711_v22  ;;  %v2321_v29 = vld [vmem:[%s2067_s25 + $0x1a] sm:$0x3] }
 0x187   : > { %v1398_v37 = vpop.eup %1397  ;;  %1401 = vpow2.f32 %v719_v32  ;;  %v735_v42 = vand.u32 2147483647, %v2281_v27  ;;  %v620_v45 = vmul.f32 1.442695, %v619_v35  ;;  %v729_v41 = vsub.f32 %v2173_v47, %v728_v30  ;;  %v2324_v34 = vld [vmem:[%s2067_s25 + $0x1c] sm:$0x3] }
 0x188   : > { %v567_v44 = vmul.f32 %v566_v33, %v2261_v60  ;;  %v703_v18 = vadd.f32 1.0, %v1398_v37  ;;  %v652_v49 = vadd.f32 %v651_v31, %v644_v62  ;;  %v2297_v46 = vsub.f32 %v696_v16, %v697_v3 }
 0x189   : > { %v732_v25 = vmax.f32 %v2281_v27, 0.0  ;;  %v736_v51 = vsub.f32 0.0, %v735_v42  ;;  %v548_v52 = vsub.f32 1.5707964, %v547_v38  ;;  %1403 = vpow2.f32 %v620_v45 }
 0x18a   : > { %v568_v55 = vadd.f32 0.2, %v567_v44  ;;  %v670_v59 = vadd.f32 %v669_v17, %v662_v12  ;;  %1405 = vlog2.f32 %v703_v18  ;;  %v753_v9 = vand.u32 2147483647, %v2295_v48 }
 0x18b   : > { %v1400_v56 = vpop.eup %1399  ;;  %v737_v4 = vmul.f32 1.442695, %v736_v51  ;;  %v762_v47 = vmul.f32 0.5, %v2265_v11  ;;  %1407 = vrcp.f32 %v511_v7  ;;  %v2306_v5 = vsub.f32 %v714_v36, %v715_v40 }
 0x18c   : > { %v569_v10 = vmul.f32 %v568_v55, %v2261_v60  ;;  %v733_v54 = vmul.f32 %v2281_v27, %v729_v41  ;;  %v746_v8 = vmul.f32 2.0, %v2265_v11  ;;  %v754_v62 = vsub.f32 0.0, %v753_v9 }
 0x18d   : > { %v1402_v20 = vpop.eup %1401  ;;  %1409 = vpow2.f32 %v737_v4  ;;  %v771_v12 = vand.u32 2147483647, %v2301_v39  ;;  %v687_v53 = vmul.f32 0.6931472, %v1400_v56  ;;  %v2311_v14 = vfloor.f32 %v762_v47 }
 0x18e   : > { %v570_v57 = vadd.f32 -0.33333334, %v569_v10  ;;  %v721_v6 = vadd.f32 1.0, %v1402_v20  ;;  %v2315_v7 = vsel %vm525_vm7, %v548_v52, %v547_v38  ;;  %v671_v16 = vadd.f32 %v670_v59, %v652_v49 }
 0x18f   : > { %v755_v21 = vmul.f32 1.442695, %v754_v62  ;;  %v772_v22 = vsub.f32 0.0, %v771_v12  ;;  %v1404_v24 = vpop.eup %1403  ;;  %v750_v28 = vmax.f32 %v2295_v48, 0.0  ;;  %v764_v63 = vmul.f32 2.0, %v2311_v14 }
 0x190   : > { %v571_v27 = vmul.f32 %v570_v57, %v2261_v60  ;;  %1411 = vlog2.f32 %v721_v6  ;;  %v1406_v30 = vpop.eup %1405  ;;  %v747_v58 = vsub.f32 %v2217_v61, %v746_v8  ;;  %v768_v31 = vmax.f32 %v2301_v39, 0.0 }
 0x191   : > { %1413 = vpow2.f32 %v755_v21  ;;  %v773_v3 = vmul.f32 1.442695, %v772_v22  ;;  %v1408_v32 = vpop.eup %1407  ;;  %v622_v35 = vadd.f32 1.0, %v1404_v24  ;;  %v688_v60 = vadd.f32 %v687_v53, %v2273_v15  ;;  %v2351_v53 = vld [vmem:[%s2067_s25 + $0x1e] sm:$0x3] }
 0x192   : > { %v572_v33 = vadd.f32 1.0, %v571_v27  ;;  %v780_v17 = vmul.f32 0.5, %v2311_v14  ;;  %v705_v37 = vmul.f32 0.6931472, %v1406_v30  ;;  %v734_v38 = vsub.f32 %v732_v25, %v733_v54 }
 0x193   : > { %v1410_v36 = vpop.eup %1409  ;;  %v789_v40 = vand.u32 2147483647, %v2321_v29  ;;  %v807_v42 = vand.u32 2147483647, %v2324_v34  ;;  %v765_v45 = vsub.f32 %v2265_v11, %v764_v63  ;;  %1415 = vpow2.f32 %v773_v3  ;;  %v2357_v63 = vld [vmem:[%s2067_s25 + $0x20] sm:$0x3] }
 0x194   : > { %v573_v61 = vmul.f32 %v572_v33, %v2251_v50  ;;  %v739_v44 = vadd.f32 1.0, %v1410_v36  ;;  %v2335_v18 = vmul.f32 %v1408_v32, %v2267_v0  ;;  %v751_v15 = vmul.f32 %v2295_v48, %v747_v58 }
 0x195   : > { %v2338_v41 = vfloor.f32 %v780_v17  ;;  %v790_v49 = vsub.f32 0.0, %v789_v40  ;;  %v689_v52 = vadd.f32 %v688_v60, %v671_v16  ;;  %v808_v55 = vsub.f32 0.0, %v807_v42 }
 0x196   : > { %v1412_v51 = vpop.eup %1411  ;;  %v574_v25 = vadd.f32 0.7853982, %v573_v61  ;;  %1417 = vlog2.f32 %v739_v44  ;;  %v706_v50 = vadd.f32 %v705_v37, %v2297_v46  ;;  %v769_v48 = vmul.f32 %v2301_v39, %v765_v45 }
 0x197   : > { %v1414_v59 = vpop.eup %1413  ;;  %1419 = vlog2.f32 %v622_v35  ;;  %v723_v56 = vmul.f32 0.6931472, %v1412_v51  ;;  %v791_v11 = vmul.f32 1.442695, %v790_v49  ;;  %v798_v9 = vmul.f32 0.5, %v2338_v41 }
 0x198   : > { %v575_v0 = vsel %vm556_vm14, %v574_v25, %v573_v61  ;;  %v757_v4 = vadd.f32 1.0, %v1414_v59  ;;  %v752_v10 = vsub.f32 %v750_v28, %v751_v15  ;;  %v782_v54 = vmul.f32 2.0, %v2338_v41 }
 0x199   : > { %v576_v47 = vsub.f32 1.5707964, %v575_v0  ;;  %1421 = vpow2.f32 %v791_v11  ;;  %v1416_v20 = vpop.eup %1415  ;;  %v786_v46 = vmax.f32 %v2321_v29, 0.0  ;;  %v799_v8 = vfloor.f32 %v798_v9 }
 0x19a   : > { %1423 = vlog2.f32 %v757_v4  ;;  %v809_v62 = vmul.f32 1.442695, %v808_v55  ;;  %v707_v12 = vadd.f32 %v706_v50, %v689_v52  ;;  %v724_v39 = vadd.f32 %v723_v56, %v2306_v5 }
 0x19b   : > { %v577_v23 = vsel %vm553_vm13, %v576_v47, %v575_v0  ;;  %v775_v57 = vadd.f32 1.0, %v1416_v20  ;;  %v770_v21 = vsub.f32 %v768_v31, %v769_v48  ;;  %v816_v22 = vmul.f32 0.5, %v799_v8  ;;  %v2375_v48 = vld [vmem:[%s2067_s25 + $0x22] sm:$0x3] }
 0x19c   : > { %v1418_v6 = vpop.eup %1417  ;;  %v578_v16 = vsub.f32 %v2315_v7, %v577_v23  ;;  %1425 = vpow2.f32 %v809_v62  ;;  %v783_v28 = vsub.f32 %v2311_v14, %v782_v54  ;;  %v804_v43 = vmax.f32 %v2324_v34, 0.0  ;;  %v2386_v62 = vld [vmem:[%s2067_s25 + $0x26] sm:$0x3] }
 0x19d   : > { %v1420_v24 = vpop.eup %1419  ;;  %v741_v27 = vmul.f32 0.6931472, %v1418_v6  ;;  %1427 = vlog2.f32 %v775_v57  ;;  %v800_v5 = vmul.f32 2.0, %v799_v8  ;;  %v2359_v58 = vfloor.f32 %v816_v22 }
 0x19e   : > { %v579_v30 = vmul.f32 %v578_v16, %v578_v16  ;;  %v825_v3 = vand.u32 2147483647, %v2351_v53  ;;  %v615_v7 = vmax.f32 %v2085_v2, 0.0  ;;  %v725_v31 = vadd.f32 %v724_v39, %v707_v12 }
 0x19f   : > { %v1422_v32 = vpop.eup %1421  ;;  %v742_v33 = vadd.f32 %v741_v27, %v734_v38  ;;  %v818_v17 = vmul.f32 2.0, %v2359_v58  ;;  %v843_v36 = vand.u32 2147483647, %v2357_v63  ;;  %v787_v40 = vmul.f32 %v2321_v29, %v783_v28 }
 0x1a0   : > { %v1424_v35 = vpop.eup %1423  ;;  %v2363_v60 = vmul.f32 0.40528473, %v579_v30  ;;  %v793_v14 = vadd.f32 1.0, %v1422_v32  ;;  %v826_v42 = vsub.f32 0.0, %v825_v3  ;;  %v834_v61 = vmul.f32 0.5, %v2359_v58 }
 0x1a1   : > { %v759_v37 = vmul.f32 0.6931472, %v1424_v35  ;;  %v2371_v15 = vmul.f32 0.6931472, %v1420_v24  ;;  %v801_v38 = vsub.f32 %v2338_v41, %v800_v5  ;;  %v819_v25 = vsub.f32 %v799_v8, %v818_v17 }
 0x1a2   : > { %v1426_v44 = vpop.eup %1425  ;;  %v581_v45 = vsub.f32 %v2363_v60, %v2277_v19  ;;  %1429 = vlog2.f32 %v793_v14  ;;  %v827_v52 = vmul.f32 1.442695, %v826_v42  ;;  %v835_v55 = vfloor.f32 %v834_v61 }
 0x1a3   : > { %v1428_v49 = vpop.eup %1427  ;;  %v811_v51 = vadd.f32 1.0, %v1426_v44  ;;  %v743_v29 = vadd.f32 %v742_v33, %v725_v31  ;;  %v760_v50 = vadd.f32 %v759_v37, %v752_v10  ;;  %v844_v56 = vsub.f32 0.0, %v843_v36  ;;  %v2383_v10 = vld [vmem:[%s2067_s25 + $0x24] sm:$0x3] }
 0x1a4   : > { %v582_v59 = vadd.f32 1.0000001, %v581_v45  ;;  %v777_v11 = vmul.f32 0.6931472, %v1428_v49  ;;  %v788_v0 = vsub.f32 %v786_v46, %v787_v40  ;;  %v852_v4 = vmul.f32 0.5, %v835_v55 }
 0x1a5   : > { %1431 = vlog2.f32 %v811_v51  ;;  %v805_v41 = vmul.f32 %v2324_v34, %v801_v38  ;;  %v822_v9 = vmax.f32 %v2351_v53, 0.0  ;;  %v845_v47 = vmul.f32 1.442695, %v844_v56 }
 0x1a6   : > { %1433 = vrcp.f32 %v582_v59  ;;  %v823_v54 = vmul.f32 %v2351_v53, %v819_v25  ;;  %v836_v20 = vmul.f32 2.0, %v835_v55  ;;  %v2380_v8 = vfloor.f32 %v852_v4  ;;  %v2411_v25 = vld [vmem:[%s2067_s25 + $0x28] sm:$0x3] }
 0x1a7   : > { %1435 = vpow2.f32 %v827_v52  ;;  %v2390_v23 = vsel %vm592_vm15, %v2229_v13, 0.0  ;;  %v761_v12 = vadd.f32 %v760_v50, %v743_v29  ;;  %v861_v39 = vand.u32 2147483647, %v2375_v48  ;;  %v2416_v29 = vld [vmem:[%s2067_s25 + $0x2a] sm:$0x3] }
 0x1a8   : > { %v1430_v46 = vpop.eup %1429  ;;  %1437 = vpow2.f32 %v845_v47  ;;  %v778_v57 = vadd.f32 %v777_v11, %v770_v21  ;;  %v854_v53 = vmul.f32 2.0, %v2380_v8  ;;  %v870_v16 = vmul.f32 0.5, %v2380_v8 }
 0x1a9   : > { %v795_v6 = vmul.f32 0.6931472, %v1430_v46  ;;  %v840_v22 = vmax.f32 %v2357_v63, 0.0  ;;  %v862_v24 = vsub.f32 0.0, %v861_v39  ;;  %v879_v27 = vand.u32 2147483647, %v2383_v10 }
 0x1aa   : > { %v897_v28 = vand.u32 2147483647, %v2386_v62  ;;  %v806_v5 = vsub.f32 %v804_v43, %v805_v41  ;;  %v2400_v3 = vsub.f32 %v822_v9, %v823_v54  ;;  %v837_v21 = vsub.f32 %v2359_v58, %v836_v20 }
 0x1ab   : > { %v1432_v30 = vpop.eup %1431  ;;  %v855_v32 = vsub.f32 %v835_v55, %v854_v53  ;;  %v863_v33 = vmul.f32 1.442695, %v862_v24  ;;  %v2403_v35 = vfloor.f32 %v870_v16  ;;  %v880_v14 = vsub.f32 0.0, %v879_v27 }
 0x1ac   : > { %v1434_v31 = vpop.eup %1433  ;;  %v898_v17 = vsub.f32 0.0, %v897_v28  ;;  %v779_v40 = vadd.f32 %v778_v57, %v761_v12  ;;  %v796_v42 = vadd.f32 %v795_v6, %v788_v0  ;;  %v858_v34 = vmax.f32 %v2375_v48, 0.0  ;;  %v2429_v6 = vld [vmem:[%s2067_s25 + $0x2c] sm:$0x3] }
 0x1ad   : > { %v1436_v36 = vpop.eup %1435  ;;  %v584_v37 = vmul.f32 %v1434_v31, %v2363_v60  ;;  %v813_v61 = vmul.f32 0.6931472, %v1432_v30  ;;  %1439 = vpow2.f32 %v863_v33  ;;  %v881_v58 = vmul.f32 1.442695, %v880_v14 }
 0x1ae   : > { %v1438_v43 = vpop.eup %1437  ;;  %v829_v44 = vadd.f32 1.0, %v1436_v36  ;;  %v841_v38 = vmul.f32 %v2357_v63, %v837_v21  ;;  %v876_v51 = vmax.f32 %v2383_v10, 0.0  ;;  %v859_v52 = vmul.f32 %v2375_v48, %v855_v32 }
 0x1af   : > { %v587_v45 = vmul.f32 %v584_v37, %v2363_v60  ;;  %v847_v49 = vadd.f32 1.0, %v1438_v43  ;;  %v888_v55 = vmul.f32 0.5, %v2403_v35  ;;  %v899_v59 = vmul.f32 1.442695, %v898_v17 }
 0x1b0   : > { %1441 = vlog2.f32 %v829_v44  ;;  %v797_v56 = vadd.f32 %v796_v42, %v779_v40  ;;  %v872_v60 = vmul.f32 2.0, %v2403_v35  ;;  %v814_v63 = vadd.f32 %v813_v61, %v806_v5 }
 0x1b1   : > { %v588_v50 = vadd.f32 %v587_v45, %v2335_v18  ;;  %1443 = vlog2.f32 %v847_v49  ;;  %v2420_v11 = vfloor.f32 %v888_v55  ;;  %v915_v0 = vand.u32 2147483647, %v2411_v25  ;;  %v2448_v45 = vld [vmem:[%s2067_s25 + $0x2e] sm:$0x3]  ;;  %v2453_v55 = vld [vmem:[%s2067_s25 + $0x30] sm:$0x3] }
 0x1b2   : > { %1445 = vpow2.f32 %v881_v58  ;;  %v842_v48 = vsub.f32 %v840_v22, %v841_v38  ;;  %v933_v41 = vand.u32 2147483647, %v2416_v29  ;;  %v860_v47 = vsub.f32 %v858_v34, %v859_v52 }
 0x1b3   : > { %v589_v4 = vsub.f32 %v2277_v19, %v588_v50  ;;  %1447 = vpow2.f32 %v899_v59  ;;  %v1440_v9 = vpop.eup %1439  ;;  %v890_v18 = vmul.f32 2.0, %v2420_v11  ;;  %v906_v54 = vmul.f32 0.5, %v2420_v11 }
 0x1b4   : > { %v916_v20 = vsub.f32 0.0, %v915_v0  ;;  %v865_v39 = vadd.f32 1.0, %v1440_v9  ;;  %v873_v57 = vsub.f32 %v2380_v8, %v872_v60  ;;  %v815_v19 = vadd.f32 %v814_v63, %v797_v56 }
 0x1b5   : > { %v590_v46 = vsub.f32 1.0, %v589_v4  ;;  %v613_v12 = vmax.f32 %v589_v4, 0.0  ;;  %v2431_v16 = vfloor.f32 %v906_v54  ;;  %v934_v24 = vsub.f32 0.0, %v933_v41 }
 0x1b6   : > { %v1442_v53 = vpop.eup %1441  ;;  %v917_v22 = vmul.f32 1.442695, %v916_v20  ;;  %1449 = vlog2.f32 %v865_v39  ;;  %v891_v31 = vsub.f32 %v2403_v35, %v890_v18  ;;  %v951_v33 = vand.u32 2147483647, %v2429_v6 }
 0x1b7   : > { %v1444_v27 = vpop.eup %1443  ;;  %v591_v28 = vmul.f32 %v2229_v13, %v590_v46  ;;  %v614_v30 = vsel %vm465_vm2, %v613_v12, 0.0  ;;  %v831_v5 = vmul.f32 0.6931472, %v1442_v53  ;;  %v877_v42 = vmul.f32 %v2383_v10, %v873_v57 }
 0x1b8   : > { %v1446_v21 = vpop.eup %1445  ;;  %v616_v32 = vmul.f32 %v614_v30, %v2085_v2  ;;  %v849_v8 = vmul.f32 0.6931472, %v1444_v27  ;;  %1451 = vpow2.f32 %v917_v22  ;;  %v908_v43 = vmul.f32 2.0, %v2431_v16 }
 0x1b9   : > { %v1448_v14 = vpop.eup %1447  ;;  %v593_v17 = vsel %vm592_vm15, %v591_v28, 0.0  ;;  %v832_v36 = vadd.f32 %v831_v5, %v2400_v3  ;;  %v883_v37 = vadd.f32 1.0, %v1446_v21  ;;  %v924_v61 = vmul.f32 0.5, %v2431_v16 }
 0x1ba   : > { %594 = vadd.xlane.f32.xlu0 %v593_v17  ;;  %v617_v26 = vsub.f32 %v615_v7, %v616_v32  ;;  %v850_v40 = vadd.f32 %v849_v8, %v842_v48  ;;  %v901_v34 = vadd.f32 1.0, %v1448_v14  ;;  %v935_v44 = vmul.f32 1.442695, %v934_v24 }
 0x1bb   : > { %v833_v35 = vadd.f32 %v832_v36, %v815_v19  ;;  %1453 = vlog2.f32 %v883_v37  ;;  %v952_v58 = vsub.f32 0.0, %v951_v33  ;;  %v894_v38 = vmax.f32 %v2386_v62, 0.0 }
 0x1bc   : > { %v625_v3 = vadd.f32 %v2371_v15, %v617_v26  ;;  %1455 = vlog2.f32 %v901_v34  ;;  %v1450_v2 = vpop.eup %1449  ;;  %v895_v49 = vmul.f32 %v2386_v62, %v891_v31  ;;  %v925_v52 = vfloor.f32 %v924_v61 }
 0x1bd   : > { %v851_v7 = vadd.f32 %v850_v40, %v833_v35  ;;  %v867_v50 = vmul.f32 0.6931472, %v1450_v2  ;;  %1457 = vpow2.f32 %v935_v44  ;;  %v953_v56 = vmul.f32 1.442695, %v952_v58 }
 0x1be   : > { %v626_v59 = vsel %vm592_vm15, %v625_v3, 0.0  ;;  %v1452_v15 = vpop.eup %1451  ;;  %v878_v60 = vsub.f32 %v876_v51, %v877_v42  ;;  %v909_v63 = vsub.f32 %v2420_v11, %v908_v43  ;;  %v942_v0 = vmul.f32 0.5, %v925_v52 }
 0x1bf   : > { %627 = vadd.xlane.f32.xlu1 %v626_v59  ;;  %v969_v4 = vand.u32 2147483647, %v2448_v45  ;;  %v868_v48 = vadd.f32 %v867_v50, %v860_v47  ;;  %v919_v62 = vadd.f32 1.0, %v1452_v15  ;;  %v926_v41 = vmul.f32 2.0, %v925_v52 }
 0x1c0   : > { %1459 = vpow2.f32 %v953_v56  ;;  %v896_v18 = vsub.f32 %v894_v38, %v895_v49  ;;  %v943_v54 = vfloor.f32 %v942_v0  ;;  %v987_v46 = vand.u32 2147483647, %v2453_v55 }
 0x1c1   : > { %v1454_v9 = vpop.eup %1453  ;;  %v970_v20 = vsub.f32 0.0, %v969_v4  ;;  %v869_v10 = vadd.f32 %v868_v48, %v851_v7  ;;  %v912_v11 = vmax.f32 %v2411_v25, 0.0  ;;  %1461 = vlog2.f32 %v919_v62 }
 0x1c2   : > { %v1456_v12 = vpop.eup %1455  ;;  %604 = vadd.xlane.f32.xlu0 %v2390_v23  ;;  %v885_v51 = vmul.f32 0.6931472, %v1454_v9  ;;  %v913_v47 = vmul.f32 %v2411_v25, %v909_v63  ;;  %v944_v57 = vmul.f32 2.0, %v943_v54  ;;  %v960_v53 = vmul.f32 0.5, %v943_v54 }
 0x1c3   : > { %v903_v39 = vmul.f32 0.6931472, %v1456_v12  ;;  %v1458_v19 = vpop.eup %1457  ;;  %v927_v24 = vsub.f32 %v2431_v16, %v926_v41  ;;  %v971_v27 = vmul.f32 1.442695, %v970_v20  ;;  %v988_v28 = vsub.f32 0.0, %v987_v46 }
 0x1c4   : > { %v886_v22 = vadd.f32 %v885_v51, %v878_v60  ;;  %v937_v5 = vadd.f32 1.0, %v1458_v19  ;;  %v945_v21 = vsub.f32 %v925_v52, %v944_v57  ;;  %v961_v8 = vfloor.f32 %v960_v53 }
 0x1c5   : > { %v904_v30 = vadd.f32 %v903_v39, %v896_v18  ;;  %1463 = vpow2.f32 %v971_v27  ;;  %v989_v31 = vmul.f32 1.442695, %v988_v28  ;;  %v914_v33 = vsub.f32 %v912_v11, %v913_v47 }
 0x1c6   : > { %v1460_v23 = vpop.eup %1459  ;;  %v887_v32 = vadd.f32 %v886_v22, %v869_v10  ;;  %v930_v14 = vmax.f32 %v2416_v29, 0.0  ;;  %1465 = vlog2.f32 %v937_v5  ;;  %v931_v36 = vmul.f32 %v2416_v29, %v927_v24 }
 0x1c7   : > { %v955_v25 = vadd.f32 1.0, %v1460_v23  ;;  %v1462_v17 = vpop.eup %1461  ;;  %v962_v37 = vmul.f32 2.0, %v961_v8  ;;  %v978_v16 = vmul.f32 0.5, %v961_v8  ;;  %1467 = vpow2.f32 %v989_v31 }
 0x1c8   : > { %v921_v26 = vmul.f32 0.6931472, %v1462_v17  ;;  %v905_v40 = vadd.f32 %v904_v30, %v887_v32  ;;  %v948_v42 = vmax.f32 %v2429_v6, 0.0  ;;  %v949_v34 = vmul.f32 %v2429_v6, %v945_v21 }
 0x1c9   : > { %1469 = vlog2.f32 %v955_v25  ;;  %v979_v35 = vfloor.f32 %v978_v16  ;;  %v932_v3 = vsub.f32 %v930_v14, %v931_v36  ;;  %v963_v44 = vsub.f32 %v943_v54, %v962_v37 }
 0x1ca   : > { %v922_v43 = vadd.f32 %v921_v26, %v914_v33  ;;  %v950_v52 = vsub.f32 %v948_v42, %v949_v34  ;;  %v966_v6 = vmax.f32 %v2448_v45, 0.0  ;;  %v984_v48 = vmax.f32 %v2453_v55, 0.0 }
 0x1cb   : > { %v1464_v61 = vpop.eup %1463  ;;  %v980_v58 = vmul.f32 2.0, %v979_v35  ;;  %v967_v63 = vmul.f32 %v2448_v45, %v963_v44  ;;  %vm1012_vm2 = vcmp.eq.s32.totalorder %v2083_v1, 2 }
 0x1cc   : > { %v1466_v2 = vpop.eup %1465  ;;  %v973_v7 = vadd.f32 1.0, %v1464_v61  ;;  %v923_v29 = vadd.f32 %v922_v43, %v905_v40 }
 0x1cd   : > { %v1468_v38 = vpop.eup %1467  ;;  %v939_v49 = vmul.f32 0.6931472, %v1466_v2  ;;  %v981_v59 = vsub.f32 %v961_v8, %v980_v58  ;;  %v968_v41 = vsub.f32 %v966_v6, %v967_v63 }
 0x1ce   : > { %1471 = vlog2.f32 %v973_v7  ;;  %v991_v56 = vadd.f32 1.0, %v1468_v38 }
 0x1cf   : > { %v1470_v50 = vpop.eup %1469  ;;  %v940_v15 = vadd.f32 %v939_v49, %v932_v3  ;;  %v985_v62 = vmul.f32 %v2453_v55, %v981_v59 }
 0x1d0   : > { %v957_v60 = vmul.f32 0.6931472, %v1470_v50  ;;  %1473 = vlog2.f32 %v991_v56 }
 0x1d1   : > { %v941_v0 = vadd.f32 %v940_v15, %v923_v29  ;;  %v986_v20 = vsub.f32 %v984_v48, %v985_v62 }
 0x1d2   : > { %v958_v4 = vadd.f32 %v957_v60, %v950_v52 }
 0x1d4   : > { %v1472_v9 = vpop.eup %1471  ;;  %v959_v18 = vadd.f32 %v958_v4, %v941_v0 }
 0x1d5   : > { %v975_v54 = vmul.f32 0.6931472, %v1472_v9 }
 0x1d6   : > { %v1474_v46 = vpop.eup %1473 }
 0x1d7   : > { %v976_v12 = vadd.f32 %v975_v54, %v968_v41  ;;  %v993_v10 = vmul.f32 0.6931472, %v1474_v46 }
 0x1d9   : > { %v977_v51 = vadd.f32 %v976_v12, %v959_v18  ;;  %v994_v11 = vadd.f32 %v993_v10, %v986_v20 }
 0x1db   : > { %v995_v39 = vadd.f32 %v994_v11, %v977_v51 }
 0x1dd   : > { %v996_v45 = vmul.f32 %v2229_v13, %v995_v39 }
 0x1df   : > { %v997_v47 = vsel %vm592_vm15, %v996_v45, 0.0 }
 0x1e0   : > { %998 = vadd.xlane.f32.xlu1 %v997_v47 }
 0x22d   : > { %v595_v57 = vpop.xlane.xlu0 %594 }
 0x22e   : > { %v596_v19 = vsel %vm592_vm15, %v595_v57, 0.0 }
 0x22f   : > { %v597_v27 = vrot.slane %v596_v19, 4 }
 0x231   : > { %v598_v5 = vadd.f32 %v597_v27, %v596_v19 }
 0x232   : > { %v628_v22 = vpop.xlane.xlu1 %627 }
 0x233   : > { %v629_v28 = vsel %vm592_vm15, %v628_v22, 0.0  ;;  %v599_v32 = vrot.slane %v598_v5, 2 }
 0x234   : > { %v630_v21 = vrot.slane %v629_v28, 4 }
 0x235   : > { %v605_v53 = vpop.xlane.xlu0 %604  ;;  %v600_v31 = vadd.f32 %v599_v32, %v598_v5 }
 0x236   : > { %v606_v55 = vsel %vm592_vm15, %v605_v53, 0.0  ;;  %v631_v13 = vadd.f32 %v630_v21, %v629_v28 }
 0x237   : > { %v607_v24 = vrot.slane %v606_v55, 4  ;;  %v601_v25 = vrot.slane %v600_v31, 1 }
 0x238   : > { %v632_v33 = vrot.slane %v631_v13, 2 }
 0x239   : > { %v608_v30 = vadd.f32 %v607_v24, %v606_v55  ;;  %v602_v26 = vadd.f32 %v601_v25, %v600_v31 }
 0x23a   : > { %v633_v17 = vadd.f32 %v632_v33, %v631_v13 }
 0x23b   : > { %v609_v23 = vrot.slane %v608_v30, 2  ;;  %v1008_v3 = vsel %vm1007_vm1, %v602_v26, 0.0 }
 0x23c   : > { %v634_v40 = vrot.slane %v633_v17, 1 }
 0x23d   : > { %v610_v8 = vadd.f32 %v609_v23, %v608_v30 }
 0x23e   : > { %v635_v43 = vadd.f32 %v634_v40, %v633_v17 }
 0x23f   : > { %v611_v14 = vrot.slane %v610_v8, 1 }
 0x240   : > { %v1013_v7 = vsel %vm1012_vm2, %v635_v43, 0.0 }
 0x241   : > { %v612_v37 = vadd.f32 %v611_v14, %v610_v8 }
 0x243   : > { %v1010_v35 = vsel %vm1009_vm0, %v612_v37, 0.0 }
 0x244   : > { %v1011_v44 = vadd.f32 %v1010_v35, %v1008_v3 }
 0x246   : > { %v1014_v38 = vadd.f32 %v1013_v7, %v1011_v44 }
 0x253   : > { %v999_v36 = vpop.xlane.xlu1 %998 }
 0x254   : > { %v1000_v16 = vsel %vm592_vm15, %v999_v36, 0.0 }
 0x255   : > { %v1001_v42 = vrot.slane %v1000_v16, 4 }
 0x257   : > { %v1002_v34 = vadd.f32 %v1001_v42, %v1000_v16 }
 0x259   : > { %v1003_v61 = vrot.slane %v1002_v34, 2 }
 0x25b   : > { %v1004_v58 = vadd.f32 %v1003_v61, %v1002_v34 }
 0x25d   : > { %v1005_v2 = vrot.slane %v1004_v58, 1 }
 0x25f   : > { %v1006_v29 = vadd.f32 %v1005_v2, %v1004_v58 }
 0x261   : > { %v1016_v49 = vsel %vm1015_vm3, %v1006_v29, 0.0 }
 0x262   : > { %v1017_v52 = vadd.f32 %v1016_v49, %v1014_v38 }
 0x264   : > { %1018 = vst [vmem:[%s2088_s15] sm:$0x1] %v1017_v52 }
 0x265 PF: > { %s2593_s4 = sld [smem:[#allocation29_spill]]  ;;  %s1031_s7 = sshll.u32 %s2088_s15, 4  ;;  %s1032_s7 = int_to_ptr.vmem [resolvable:$true] %s1031_s7 }
 0x266   : > { %s2594_s14 = sld [smem:[#allocation38_spill]]  ;;  %s1020_s18 = scalar_lea.sflag [#allocation8], %s2057_s29 }
 0x26c   : > { %s2595_s19 = smov %s2594_s14  ;;  %s1029_s21 = scalar_lea.hbm %s2594_s14, %s2593_s4 }
 0x26d   : > { %s1033_s16 = sshll.u32 %s1029_s21, 4  ;;  %s1621_s23 = scalar_lea.hbm %s2595_s19, 6  ;;  %s1034_s16 = int_to_ptr.hbm [resolvable:$true] %s1033_s16 }
 0x26e   : > { %s1615_s6 = sshra.s32 %s1034_s16, 4  ;;  %s1616_s6 = int_to_ptr.hbm [resolvable:$true] %s1615_s6 }
 0x26f   : > { %s1617_s10 = scalar_lea.hbm %s1616_s6, 1  ;;  %p1622_p7 = scmp.lt.s32.totalorder %s1616_s6, %s2595_s19 }
 0x270   : > { %p1618_p6 = scmp.ne.s32.totalorder %s1616_s6, %s1617_s10  ;;  %p1623_p1 = scmp.lt.s32.totalorder %s1621_s23, %s1617_s10 }
 0x272   : > { %p1619_p9 = pnand %p1618_p6, %p1974_p11  ;;  %p1624_p5 = por %p1623_p1, %p1622_p7 }
 0x274   : > { %p1620_p4 = pneg %p1619_p9 }
 0x276   : > { %p1625_p3 = pnand %p1624_p5, %p1620_p4 }
 0x278   : > { %1628 = shalt.err (!%p1625_p3)
}
 0x279   : > { %1229 = dma.vmem_to_hbm [thread:$0]  (%p1974_p11), %s1032_s7, 16, %s1034_s16, %s1020_s18  }
 0x27a PF: > { %s2596_s29 = sld [smem:[#allocation32_spill]]  ;;  %p1254_p12 = scmp.ge.s32.totalorder %s1741_s17, 2 }
 0x27b   : > { %s1045_s25 = sand.u32 1, %s1721_s12  }
 0x27c   : > { %s1046_s8 = scalar_lea.sflag [#allocation8], %s1045_s25 }
 0x280   : > { %p2597_p13 = scmp.ne.s32.totalorder %s2596_s29, 0 }
 0x282   : > { %p1250_p2 = pnand %p1254_p12, %p2597_p13 }
 0x284   : > { %p1251_p0 = pneg %p1250_p2 }
 0x286   : > { %1692 = dma.done.wait (%p1251_p0), %s1046_s8, 16  }
 0x287   : > { %1694 = vsyncadd (%p1251_p0), %s1046_s8, 4294967280  ;;  %s43_s17 = sadd.s32 1, %s1741_s17   ;;  %s2598_s24 = sld [smem:[#allocation26_spill]] }
 0x288   : > { %p40_p10 = scmp.ge.s32.totalorder %s43_s17, 8   ;;  %s2599_s9 = sld [smem:[#allocation35_spill]] }
 0x289   : > { %s2600_s26 = sld [smem:[#allocation27_spill]]  ;;  %s2606_s0 = smov %s1701_s1 }
 0x28a   : > { %s2601_s11 = sld [smem:[#allocation33_spill]]  ;;  %s2608_s10 = smov %s1713_s2 }
 0x28b   : > { %s2602_s28 = sld [smem:[#allocation28_spill]]  ;;  %s2610_s12 = smov %s1725_s13 }
 0x28c   : > { %s2603_s14 = sld [smem:[#allocation34_spill]] }
 0x28d   : > { %s2604_s15 = sld [smem:[#allocation30_spill]]  ;;  %s2607_s1 = smov %s2598_s24 }
 0x28e   : > { %s2605_s16 = sld [smem:[#allocation31_spill]]  ;;  %42 = sbr.rel (!%p40_p10) target bundleno = 22 (0x16), region = 139 }
 0x28f   : > { %s2609_s2 = smov %s2600_s26 }
 0x291   : > { %s2611_s13 = smov %s2602_s28 }
 0x293   :  { %1051 = vsyncpa [#allocation7], 1 }
 0x294   :  { %1053 = vsyncpa [#allocation7 + $0x1], 1 }
 0x295   :  { %1054 = vsyncpa [#allocation10], 1 }
 0x296   :  { %1056 = vsyncpa [#allocation10 + $0x1], 1 }
 0x297   :  { %1057 = vsyncpa [#allocation8], 1 }
 0x298   :  { %1059 = vsyncpa [#allocation8 + $0x1], 1 }

</bundles_post_ra>
